<compile_context>
chip_gen: v7x
topology: tpu7x:2x2x1
jax: 0.10.0
libtpu: 0.0.40
codegen_flags: <defaults>
</compile_context>

<pallas_src>
import jax
import jax.numpy as jnp
from jax.experimental import pallas as pl
from jax.experimental.pallas import tpu as pltpu


def _chip_tuning():
    """(scoped VMEM budget, preferred output-tile width) per chip generation.

    v5e/v6e: 128 MiB physical VMEM -> spend it on bigger output tiles (fewer
    ~0.35us grid steps, higher fraction of HBM roofline).
    v7x: only 64 MiB physical VMEM -> keep the 32 MiB scoped budget and
    1024-wide tiles.  Falls back to the conservative setting if the query fails.
    """
    try:
        vmem_cap = pltpu.get_tpu_info().vmem_capacity_bytes
    except Exception:
        vmem_cap = 64 * 1024 * 1024
    if vmem_cap >= 100 * 1024 * 1024:     # v5e / v6e
        return 64 * 1024 * 1024, 2048
    return 32 * 1024 * 1024, 1024         # v7x


_VMEM_LIMIT_BYTES, _TN_PREF = _chip_tuning()


def _round_up(x, m):
    return ((x + m - 1) // m) * m


def _sigmoid_via_tanh(x):
    # sigmoid(x) = 0.5 * (tanh(0.5*x) + 1): a single EUP transcendental
    # instead of exp + reciprocal (the EUP is the serial-path bottleneck).
    return 0.5 * (jnp.tanh(0.5 * x) + 1.0)


# ---------------------------------------------------------------------------
# Tiled matmul + bias kernels (input pre-activations and vocab projection).
# ---------------------------------------------------------------------------
def _matmul_bias_f32_kernel(x_ref, w_ref, b_ref, o_ref):
    # f32 output: accumulate directly into the resident output block (its
    # index_map ignores the K axis) -- no scratch, no final acc->o copy.
    k = pl.program_id(2)

    @pl.when(k == 0)
    def _():
        o_ref[...] = jnp.broadcast_to(b_ref[...], o_ref.shape)

    o_ref[...] += jnp.dot(x_ref[...], w_ref[...],
                          preferred_element_type=jnp.float32)


def _matmul_bias_acc_kernel(x_ref, w_ref, b_ref, o_ref, acc_ref):
    # Narrow (bf16) output: keep an f32 VMEM accumulator, cast once at the end.
    k = pl.program_id(2)

    @pl.when(k == 0)
    def _():
        acc_ref[...] = jnp.zeros_like(acc_ref)

    acc_ref[...] += jnp.dot(x_ref[...], w_ref[...],
                            preferred_element_type=jnp.float32)

    @pl.when(k == pl.num_programs(2) - 1)
    def _():
        o_ref[...] = (acc_ref[...] + b_ref[...]).astype(o_ref.dtype)


def matmul_bias(x, w, b, *, out_dtype=jnp.bfloat16,
                tm_pref=256, tn_pref=None, tk_pref=512):
    """(M, K) @ (K, N) + (1, N) -> (M, N), f32 accumulation on the MXU.

    Non-divisible M/N/K are zero-padded to tile multiples and the result is
    sliced back, so arbitrary vocab sizes and B*T are supported.
    """
    if tn_pref is None:
        tn_pref = _TN_PREF
    M, K = x.shape
    K2, N = w.shape
    assert K == K2 and b.shape == (1, N)

    tm = min(tm_pref, _round_up(M, 8))
    tn = min(tn_pref, _round_up(N, 128))
    tk = min(tk_pref, _round_up(K, 128))
    Mp, Np, Kp = _round_up(M, tm), _round_up(N, tn), _round_up(K, tk)

    if (Mp, Kp) != (M, K):
        x = jnp.pad(x, ((0, Mp - M), (0, Kp - K)))
    if (Kp, Np) != (K, N):
        w = jnp.pad(w, ((0, Kp - K), (0, Np - N)))
    if Np != N:
        b = jnp.pad(b, ((0, 0), (0, Np - N)))

    if jnp.dtype(out_dtype) == jnp.dtype(jnp.float32):
        kernel = _matmul_bias_f32_kernel
        scratch = []
    else:
        kernel = _matmul_bias_acc_kernel
        scratch = [pltpu.VMEM((tm, tn), jnp.float32)]

    out = pl.pallas_call(
        kernel,
        out_shape=jax.ShapeDtypeStruct((Mp, Np), out_dtype),
        grid_spec=pltpu.PrefetchScalarGridSpec(
            num_scalar_prefetch=0,
            grid=(Mp // tm, Np // tn, Kp // tk),
            in_specs=[
                pl.BlockSpec((tm, tk), lambda i, j, k: (i, k)),
                pl.BlockSpec((tk, tn), lambda i, j, k: (k, j)),
                pl.BlockSpec((1, tn), lambda i, j, k: (0, j)),
            ],
            out_specs=pl.BlockSpec((tm, tn), lambda i, j, k: (i, j)),
            scratch_shapes=scratch,
        ),
        compiler_params=pltpu.CompilerParams(
            dimension_semantics=("parallel", "parallel", "arbitrary"),
            vmem_limit_bytes=_VMEM_LIMIT_BYTES,
        ),
    )(x, w, b)

    if (Mp, Np) != (M, N):
        out = out[:M, :N]
    return out


# ---------------------------------------------------------------------------
# LSTM recurrence kernel: grid over (batch_blocks, T); h/c carried in VMEM
# scratch; one timestep of the bf16 pre-activations resident at a time.
# Consumes precomputed xg[t] = x[t] @ W_ih^T + (b_ih + b_hh).
# ---------------------------------------------------------------------------
def lstm_recurrence(xg_tm, w_hh_t, *, out_dtype=jnp.bfloat16):
    """xg_tm: (T, B, 4H) bf16, w_hh_t: (H, 4H) bf16 -> (T, B, H) out_dtype."""
    T, B, G = xg_tm.shape
    H = G // 4
    # Shard the batch across v7x's two TensorCores when there are at least two
    # sublane-aligned (>=8-row) blocks; single block otherwise (v5e/v6e: 1 TC).
    batch_blocks = 2 if (B % 16 == 0) else 1
    bb = B // batch_blocks

    def kernel(xg_ref, whh_ref, h_out_ref, h_sc, c_sc):
        t = pl.program_id(1)

        @pl.when(t == 0)
        def _():
            h_sc[...] = jnp.zeros_like(h_sc)
            c_sc[...] = jnp.zeros_like(c_sc)

        # Only the (bb, H) @ (H, 4H) hidden-to-hidden matmul is on the serial
        # path; W_hh stays resident in VMEM across all grid steps.
        gates = xg_ref[0].astype(jnp.float32) + jnp.dot(
            h_sc[...].astype(whh_ref.dtype), whh_ref[...],
            preferred_element_type=jnp.float32)
        # PyTorch gate order: input, forget, cell, output.
        # H is a multiple of 128 so each slice is lane-aligned.
        i = _sigmoid_via_tanh(gates[:, 0 * H:1 * H])
        f = _sigmoid_via_tanh(gates[:, 1 * H:2 * H])
        g = jnp.tanh(gates[:, 2 * H:3 * H])
        o = _sigmoid_via_tanh(gates[:, 3 * H:4 * H])
        c = f * c_sc[...] + i * g
        h = o * jnp.tanh(c)
        h_sc[...] = h
        c_sc[...] = c
        h_out_ref[0] = h.astype(h_out_ref.dtype)

    return pl.pallas_call(
        kernel,
        out_shape=jax.ShapeDtypeStruct((T, B, H), out_dtype),
        grid_spec=pltpu.PrefetchScalarGridSpec(
            num_scalar_prefetch=0,
            grid=(batch_blocks, T),
            in_specs=[
                pl.BlockSpec((1, bb, G), lambda b, t: (t, b, 0)),   # xg[t]
                pl.BlockSpec((H, G), lambda b, t: (0, 0)),          # W_hh (resident)
            ],
            out_specs=pl.BlockSpec((1, bb, H), lambda b, t: (t, b, 0)),
            scratch_shapes=[pltpu.VMEM((bb, H), jnp.float32),       # h carry
                            pltpu.VMEM((bb, H), jnp.float32)],      # c carry
        ),
        compiler_params=pltpu.CompilerParams(
            dimension_semantics=("parallel", "arbitrary"),
            vmem_limit_bytes=_VMEM_LIMIT_BYTES,
        ),
    )(xg_tm, w_hh_t)


# ---------------------------------------------------------------------------
# Full forward pass.
# ---------------------------------------------------------------------------
def decoder_rnn_forward(features, captions, params):
    """features: (B, E) f32, captions: (B, L) int32 -> logits (B, L, V) bf16."""
    # --- XLA glue: embedding gather + eval-mode dropout + concat ---
    emb = jnp.take(params["embedding"], captions[:, :-1], axis=0)    # (B, L-1, E)
    # TODO(synk): training-mode Dropout(p=0.5) omitted (eval-mode identity).
    x = jnp.concatenate([features[:, None, :], emb], axis=1)         # (B, T, E)

    B, T, E = x.shape
    H = params["w_hh_t"].shape[0]
    V = params["w_out_t"].shape[1]

    # Phase 1: batched input pre-activations for every timestep (MXU-dense),
    # stored bf16 to halve the intermediate's HBM write + re-read.
    x_tm = jnp.transpose(x, (1, 0, 2)).astype(jnp.bfloat16)          # (T, B, E) small
    xg = matmul_bias(x_tm.reshape(T * B, E),
                     params["w_ih_t"], params["b"],
                     out_dtype=jnp.bfloat16)                         # (T*B, 4H) bf16
    xg_tm = xg.reshape(T, B, 4 * H)

    # Phase 2: serial LSTM recurrence (only h @ W_hh per step); h written bf16.
    h_tm = lstm_recurrence(xg_tm, params["w_hh_t"],
                           out_dtype=jnp.bfloat16)                   # (T, B, H) bf16

    # Phase 3: hoisted vocab projection, rows ordered batch-first so the final
    # reshape is free; logits emitted bf16 (largest HBM write halved).
    h_bt = jnp.transpose(h_tm, (1, 0, 2)).reshape(B * T, H)          # small re-layout
    logits = matmul_bias(h_bt, params["w_out_t"], params["b_out"],
                         out_dtype=jnp.bfloat16)                     # (B*T, V) bf16
    return logits.reshape(B, T, V)


# ---------------------------------------------------------------------------
# Pure-JAX reference (mirrors the kernel's bf16 weight / f32 accumulation and
# bf16 intermediates).
# ---------------------------------------------------------------------------
def decoder_rnn_reference(features, captions, params):
    emb = jnp.take(params["embedding"], captions[:, :-1], axis=0)
    x = jnp.concatenate([features[:, None, :], emb], axis=1)
    B, T, E = x.shape
    H = params["w_hh_t"].shape[0]

    xg = (jnp.einsum("bte,eg->btg", x.astype(jnp.bfloat16), params["w_ih_t"],
                     preferred_element_type=jnp.float32)
          + params["b"]).astype(jnp.bfloat16)                        # (B, T, 4H)

    def step(carry, xg_t):
        h, c = carry
        gates = xg_t.astype(jnp.float32) + jnp.dot(
            h.astype(jnp.bfloat16), params["w_hh_t"],
            preferred_element_type=jnp.float32)
        i = _sigmoid_via_tanh(gates[:, 0 * H:1 * H])
        f = _sigmoid_via_tanh(gates[:, 1 * H:2 * H])
        g = jnp.tanh(gates[:, 2 * H:3 * H])
        o = _sigmoid_via_tanh(gates[:, 3 * H:4 * H])
        c = f * c + i * g
        h = o * jnp.tanh(c)
        return (h, c), h.astype(jnp.bfloat16)

    init = (jnp.zeros((B, H), jnp.float32), jnp.zeros((B, H), jnp.float32))
    _, hs = jax.lax.scan(step, init, jnp.transpose(xg, (1, 0, 2)))
    hs = jnp.transpose(hs, (1, 0, 2))                                # (B, T, H) bf16
    logits = (jnp.einsum("bth,hv->btv", hs, params["w_out_t"],
                         preferred_element_type=jnp.float32)
              + params["b_out"]).astype(jnp.bfloat16)
    return logits


def init_params(key, vocab_size, embed_size, hidden_size):
    ks = jax.random.split(key, 6)
    s = 0.1
    bf = jnp.bfloat16
    return {
        "embedding": s * jax.random.normal(ks[0], (vocab_size, embed_size), jnp.float32),
        # Stored pre-transposed and in bf16 (f32 accumulation on the MXU):
        # (E, 4H) and (H, 4H); PyTorch gate order i, f, g, o.
        "w_ih_t": (s * jax.random.normal(ks[1], (embed_size, 4 * hidden_size))).astype(bf),
        "w_hh_t": (s * jax.random.normal(ks[2], (hidden_size, 4 * hidden_size))).astype(bf),
        # b = b_ih + b_hh (sum the two PyTorch biases when importing real weights).
        "b": s * jax.random.normal(ks[3], (1, 4 * hidden_size), jnp.float32),
        "w_out_t": (s * jax.random.normal(ks[4], (hidden_size, vocab_size))).astype(bf),
        "b_out": s * jax.random.normal(ks[5], (1, vocab_size), jnp.float32),
    }


if __name__ == "__main__":
    # Small shapes consistent with the module (embed=hidden=256 as in the spec),
    # vreg-aligned: B multiple of 8 (sublanes), E/H/V multiples of 128 (lanes);
    # H a multiple of 256 keeps the MXU contraction dim full on v6e/v7x.
    batch = 8
    embed_size = 256
    hidden_size = 256
    vocab_size = 512
    cap_len = 8          # -> sequence length T = 1 + (cap_len - 1) = 8

    key = jax.random.PRNGKey(0)
    k_params, k_feat, k_cap = jax.random.split(key, 3)

    params = init_params(k_params, vocab_size, embed_size, hidden_size)
    features = jax.random.normal(k_feat, (batch, embed_size), jnp.float32)
    captions = jax.random.randint(k_cap, (batch, cap_len), 0, vocab_size, jnp.int32)

    logits = jax.jit(decoder_rnn_forward)(features, captions, params)
    logits = jax.block_until_ready(logits)
    assert logits.shape == (batch, cap_len, vocab_size), logits.shape
    assert logits.dtype == jnp.bfloat16, logits.dtype

    ref = decoder_rnn_reference(features, captions, params)
    err = float(jnp.max(jnp.abs(logits.astype(jnp.float32) - ref.astype(jnp.float32))))
    assert err < 5e-2, f"max abs error {err}"

    print("KERNEL_OK")
</pallas_src>

<mosaic_0001>
module attributes {stable_mosaic.version = 11 : i64} {
  func.func @_matmul_bias_acc_kernel(%arg0: i32, %arg1: i32, %arg2: i32, %arg3: memref<64x256xbf16, #tpu.memory_space<vmem>>, %arg4: memref<256x1024xbf16, #tpu.memory_space<vmem>>, %arg5: memref<1x1024xf32, #tpu.memory_space<vmem>>, %arg6: memref<64x1024xbf16, #tpu.memory_space<vmem>>, %arg7: memref<64x1024xf32, #tpu.memory_space<vmem>>) attributes {dimension_semantics = [#tpu.dimension_semantics<parallel>, #tpu.dimension_semantics<parallel>, #tpu.dimension_semantics<arbitrary>], iteration_bounds = array<i64: 1, 1, 1>, scalar_prefetch = 0 : i64, scratch_operands = 1 : i64, tpu.core_type = #tpu.core_type<tc>, window_params = [{transform_indices = @transform_0, window_bounds = array<i64: 64, 256>}, {transform_indices = @transform_1, window_bounds = array<i64: 256, 1024>}, {transform_indices = @transform_2, window_bounds = array<i64: 1, 1024>}, {transform_indices = @transform_3, window_bounds = array<i64: 64, 1024>}]} {
    %c0_i32 = arith.constant 0 : i32
    %0 = arith.cmpi eq, %arg2, %c0_i32 : i32
    %1 = arith.extui %0 : i1 to i32
    %c0_i32_0 = arith.constant 0 : i32
    %2 = arith.cmpi ne, %1, %c0_i32_0 : i32
    scf.if %2 {
      %cst_10 = arith.constant 0.000000e+00 : f32
      %12 = vector.broadcast %cst_10 : f32 to vector<64x1024xf32>
      %c0_11 = arith.constant 0 : index
      %c0_12 = arith.constant 0 : index
      %13 = vector.load %arg7[%c0_11, %c0_12] : memref<64x1024xf32, #tpu.memory_space<vmem>>, vector<64x1024xf32>
      tpu.vector_store %arg7[%c0_11, %c0_12], %12 {strides = array<i32>} : memref<64x1024xf32, #tpu.memory_space<vmem>>, vector<64x1024xf32>,
    } else {
    }
    %c0 = arith.constant 0 : index
    %c0_1 = arith.constant 0 : index
    %3 = vector.load %arg7[%c0, %c0_1] : memref<64x1024xf32, #tpu.memory_space<vmem>>, vector<64x1024xf32>
    %c0_2 = arith.constant 0 : index
    %c0_3 = arith.constant 0 : index
    %4 = vector.load %arg3[%c0_2, %c0_3] : memref<64x256xbf16, #tpu.memory_space<vmem>>, vector<64x256xbf16>
    %c0_4 = arith.constant 0 : index
    %c0_5 = arith.constant 0 : index
    %5 = vector.load %arg4[%c0_4, %c0_5] : memref<256x1024xbf16, #tpu.memory_space<vmem>>, vector<256x1024xbf16>
    %cst = arith.constant dense<0.000000e+00> : vector<64x1024xf32>
    %6 = tpu.matmul %4, %5, %cst {dimension_numbers = #tpu.dot_dimension_numbers<[1], [0], [0], [1], [0, 0, 1, 1], [], []>} : vector<64x256xbf16>, vector<256x1024xbf16>, vector<64x1024xf32> -> vector<64x1024xf32>
    %7 = arith.addf %3, %6 : vector<64x1024xf32>
    %c0_6 = arith.constant 0 : index
    %c0_7 = arith.constant 0 : index
    %8 = vector.load %arg7[%c0_6, %c0_7] : memref<64x1024xf32, #tpu.memory_space<vmem>>, vector<64x1024xf32>
    tpu.vector_store %arg7[%c0_6, %c0_7], %7 {strides = array<i32>} : memref<64x1024xf32, #tpu.memory_space<vmem>>, vector<64x1024xf32>,
    %c0_i32_8 = arith.constant 0 : i32
    %9 = arith.cmpi eq, %arg2, %c0_i32_8 : i32
    %10 = arith.extui %9 : i1 to i32
    %c0_i32_9 = arith.constant 0 : i32
    %11 = arith.cmpi ne, %10, %c0_i32_9 : i32
    scf.if %11 {
      %c0_10 = arith.constant 0 : index
      %c0_11 = arith.constant 0 : index
      %12 = vector.load %arg7[%c0_10, %c0_11] : memref<64x1024xf32, #tpu.memory_space<vmem>>, vector<64x1024xf32>
      %c0_12 = arith.constant 0 : index
      %c0_13 = arith.constant 0 : index
      %13 = vector.load %arg5[%c0_12, %c0_13] : memref<1x1024xf32, #tpu.memory_space<vmem>>, vector<1x1024xf32>
      %14 = vector.broadcast %13 : vector<1x1024xf32> to vector<64x1024xf32>
      %15 = arith.addf %12, %14 : vector<64x1024xf32>
      %16 = arith.truncf %15 : vector<64x1024xf32> to vector<64x1024xbf16>
      %c0_14 = arith.constant 0 : index
      %c0_15 = arith.constant 0 : index
      %17 = vector.load %arg6[%c0_14, %c0_15] : memref<64x1024xbf16, #tpu.memory_space<vmem>>, vector<64x1024xbf16>
      tpu.vector_store %arg6[%c0_14, %c0_15], %16 {strides = array<i32>} : memref<64x1024xbf16, #tpu.memory_space<vmem>>, vector<64x1024xbf16>,
    } else {
    }
    return
  }
  func.func @transform_0(%arg0: i32, %arg1: i32, %arg2: i32) -> (i32, i32) {
    %c0_i32 = arith.constant 0 : i32
    return %arg0, %arg2 : i32, i32
  }
  func.func @transform_1(%arg0: i32, %arg1: i32, %arg2: i32) -> (i32, i32) {
    %c0_i32 = arith.constant 0 : i32
    return %arg2, %arg1 : i32, i32
  }
  func.func @transform_2(%arg0: i32, %arg1: i32, %arg2: i32) -> (i32, i32) {
    %c0_i32 = arith.constant 0 : i32
    %c0_i32_0 = arith.constant 0 : i32
    return %c0_i32, %arg1 : i32, i32
  }
  func.func @transform_3(%arg0: i32, %arg1: i32, %arg2: i32) -> (i32, i32) {
    %c0_i32 = arith.constant 0 : i32
    return %arg0, %arg1 : i32, i32
  }
}

module attributes {stable_mosaic.version = 11 : i64} {
  func.func @kernel(%arg0: i32, %arg1: i32, %arg2: memref<1x8x1024xbf16, #tpu.memory_space<vmem>>, %arg3: memref<256x1024xbf16, #tpu.memory_space<vmem>>, %arg4: memref<1x8x256xbf16, #tpu.memory_space<vmem>>, %arg5: memref<8x256xf32, #tpu.memory_space<vmem>>, %arg6: memref<8x256xf32, #tpu.memory_space<vmem>>) attributes {dimension_semantics = [#tpu.dimension_semantics<parallel>, #tpu.dimension_semantics<arbitrary>], iteration_bounds = array<i64: 1, 8>, scalar_prefetch = 0 : i64, scratch_operands = 2 : i64, tpu.core_type = #tpu.core_type<tc>, window_params = [{transform_indices = @transform_0, window_bounds = array<i64: 1, 8, 1024>}, {pipeline_mode = #tpu.pipeline_mode<synchronous>, transform_indices = @transform_1, window_bounds = array<i64: 256, 1024>}, {transform_indices = @transform_2, window_bounds = array<i64: 1, 8, 256>}]} {
    %c0_i32 = arith.constant 0 : i32
    %0 = arith.cmpi eq, %arg1, %c0_i32 : i32
    %1 = arith.extui %0 : i1 to i32
    %c0_i32_0 = arith.constant 0 : i32
    %2 = arith.cmpi ne, %1, %c0_i32_0 : i32
    scf.if %2 {
      %cst_25 = arith.constant 0.000000e+00 : f32
      %49 = vector.broadcast %cst_25 : f32 to vector<8x256xf32>
      %c0_26 = arith.constant 0 : index
      %c0_27 = arith.constant 0 : index
      %50 = vector.load %arg5[%c0_26, %c0_27] : memref<8x256xf32, #tpu.memory_space<vmem>>, vector<8x256xf32>
      tpu.vector_store %arg5[%c0_26, %c0_27], %49 {strides = array<i32>} : memref<8x256xf32, #tpu.memory_space<vmem>>, vector<8x256xf32>,
      %cst_28 = arith.constant 0.000000e+00 : f32
      %51 = vector.broadcast %cst_28 : f32 to vector<8x256xf32>
      %c0_29 = arith.constant 0 : index
      %c0_30 = arith.constant 0 : index
      %52 = vector.load %arg6[%c0_29, %c0_30] : memref<8x256xf32, #tpu.memory_space<vmem>>, vector<8x256xf32>
      tpu.vector_store %arg6[%c0_29, %c0_30], %51 {strides = array<i32>} : memref<8x256xf32, #tpu.memory_space<vmem>>, vector<8x256xf32>,
    } else {
    }
    %c0 = arith.constant 0 : index
    %c0_1 = arith.constant 0 : index
    %c0_2 = arith.constant 0 : index
    %3 = vector.load %arg2[%c0, %c0_1, %c0_2] : memref<1x8x1024xbf16, #tpu.memory_space<vmem>>, vector<1x8x1024xbf16>
    %4 = vector.shape_cast %3 : vector<1x8x1024xbf16> to vector<8x1024xbf16>
    %5 = arith.extf %4 : vector<8x1024xbf16> to vector<8x1024xf32>
    %c0_3 = arith.constant 0 : index
    %c0_4 = arith.constant 0 : index
    %6 = vector.load %arg5[%c0_3, %c0_4] : memref<8x256xf32, #tpu.memory_space<vmem>>, vector<8x256xf32>
    %7 = arith.truncf %6 : vector<8x256xf32> to vector<8x256xbf16>
    %c0_5 = arith.constant 0 : index
    %c0_6 = arith.constant 0 : index
    %8 = vector.load %arg3[%c0_5, %c0_6] : memref<256x1024xbf16, #tpu.memory_space<vmem>>, vector<256x1024xbf16>
    %cst = arith.constant dense<0.000000e+00> : vector<8x1024xf32>
    %9 = tpu.matmul %7, %8, %cst {dimension_numbers = #tpu.dot_dimension_numbers<[1], [0], [0], [1], [0, 0, 1, 1], [], []>} : vector<8x256xbf16>, vector<256x1024xbf16>, vector<8x1024xf32> -> vector<8x1024xf32>
    %10 = arith.addf %5, %9 : vector<8x1024xf32>
    %11 = vector.extract_strided_slice %10 {offsets = [0, 0], sizes = [8, 256], strides = [1, 1]} : vector<8x1024xf32> to vector<8x256xf32>
    %cst_7 = arith.constant 5.000000e-01 : f32
    %12 = vector.broadcast %cst_7 : f32 to vector<8x256xf32>
    %13 = arith.mulf %12, %11 : vector<8x256xf32>
    %14 = math.tanh %13 : vector<8x256xf32>
    %cst_8 = arith.constant 1.000000e+00 : f32
    %15 = vector.broadcast %cst_8 : f32 to vector<8x256xf32>
    %16 = arith.addf %14, %15 : vector<8x256xf32>
    %cst_9 = arith.constant 5.000000e-01 : f32
    %17 = vector.broadcast %cst_9 : f32 to vector<8x256xf32>
    %18 = arith.mulf %17, %16 : vector<8x256xf32>
    %19 = vector.extract_strided_slice %10 {offsets = [0, 256], sizes = [8, 256], strides = [1, 1]} : vector<8x1024xf32> to vector<8x256xf32>
    %cst_10 = arith.constant 5.000000e-01 : f32
    %20 = vector.broadcast %cst_10 : f32 to vector<8x256xf32>
    %21 = arith.mulf %20, %19 : vector<8x256xf32>
    %22 = math.tanh %21 : vector<8x256xf32>
    %cst_11 = arith.constant 1.000000e+00 : f32
    %23 = vector.broadcast %cst_11 : f32 to vector<8x256xf32>
    %24 = arith.addf %22, %23 : vector<8x256xf32>
    %cst_12 = arith.constant 5.000000e-01 : f32
    %25 = vector.broadcast %cst_12 : f32 to vector<8x256xf32>
    %26 = arith.mulf %25, %24 : vector<8x256xf32>
    %27 = vector.extract_strided_slice %10 {offsets = [0, 512], sizes = [8, 256], strides = [1, 1]} : vector<8x1024xf32> to vector<8x256xf32>
    %28 = math.tanh %27 : vector<8x256xf32>
    %29 = vector.extract_strided_slice %10 {offsets = [0, 768], sizes = [8, 256], strides = [1, 1]} : vector<8x1024xf32> to vector<8x256xf32>
    %cst_13 = arith.constant 5.000000e-01 : f32
    %30 = vector.broadcast %cst_13 : f32 to vector<8x256xf32>
    %31 = arith.mulf %30, %29 : vector<8x256xf32>
    %32 = math.tanh %31 : vector<8x256xf32>
    %cst_14 = arith.constant 1.000000e+00 : f32
    %33 = vector.broadcast %cst_14 : f32 to vector<8x256xf32>
    %34 = arith.addf %32, %33 : vector<8x256xf32>
    %cst_15 = arith.constant 5.000000e-01 : f32
    %35 = vector.broadcast %cst_15 : f32 to vector<8x256xf32>
    %36 = arith.mulf %35, %34 : vector<8x256xf32>
    %c0_16 = arith.constant 0 : index
    %c0_17 = arith.constant 0 : index
    %37 = vector.load %arg6[%c0_16, %c0_17] : memref<8x256xf32, #tpu.memory_space<vmem>>, vector<8x256xf32>
    %38 = arith.mulf %26, %37 : vector<8x256xf32>
    %39 = arith.mulf %18, %28 : vector<8x256xf32>
    %40 = arith.addf %38, %39 : vector<8x256xf32>
    %41 = math.tanh %40 : vector<8x256xf32>
    %42 = arith.mulf %36, %41 : vector<8x256xf32>
    %c0_18 = arith.constant 0 : index
    %c0_19 = arith.constant 0 : index
    %43 = vector.load %arg5[%c0_18, %c0_19] : memref<8x256xf32, #tpu.memory_space<vmem>>, vector<8x256xf32>
    tpu.vector_store %arg5[%c0_18, %c0_19], %42 {strides = array<i32>} : memref<8x256xf32, #tpu.memory_space<vmem>>, vector<8x256xf32>,
    %c0_20 = arith.constant 0 : index
    %c0_21 = arith.constant 0 : index
    %44 = vector.load %arg6[%c0_20, %c0_21] : memref<8x256xf32, #tpu.memory_space<vmem>>, vector<8x256xf32>
    tpu.vector_store %arg6[%c0_20, %c0_21], %40 {strides = array<i32>} : memref<8x256xf32, #tpu.memory_space<vmem>>, vector<8x256xf32>,
    %45 = arith.truncf %42 : vector<8x256xf32> to vector<8x256xbf16>
    %c0_22 = arith.constant 0 : index
    %c0_23 = arith.constant 0 : index
    %c0_24 = arith.constant 0 : index
    %46 = vector.load %arg4[%c0_22, %c0_23, %c0_24] : memref<1x8x256xbf16, #tpu.memory_space<vmem>>, vector<1x8x256xbf16>
    %47 = vector.shape_cast %46 : vector<1x8x256xbf16> to vector<8x256xbf16>
    %48 = vector.shape_cast %45 : vector<8x256xbf16> to vector<1x8x256xbf16>
    tpu.vector_store %arg4[%c0_22, %c0_23, %c0_24], %48 {strides = array<i32>} : memref<1x8x256xbf16, #tpu.memory_space<vmem>>, vector<1x8x256xbf16>,
    return
  }
  func.func @transform_0(%arg0: i32, %arg1: i32) -> (i32, i32, i32) {
    %c0_i32 = arith.constant 0 : i32
    %c0_i32_0 = arith.constant 0 : i32
    return %arg1, %arg0, %c0_i32 : i32, i32, i32
  }
  func.func @transform_1(%arg0: i32, %arg1: i32) -> (i32, i32) {
    %c0_i32 = arith.constant 0 : i32
    %c0_i32_0 = arith.constant 0 : i32
    %c0_i32_1 = arith.constant 0 : i32
    return %c0_i32, %c0_i32_0 : i32, i32
  }
  func.func @transform_2(%arg0: i32, %arg1: i32) -> (i32, i32, i32) {
    %c0_i32 = arith.constant 0 : i32
    %c0_i32_0 = arith.constant 0 : i32
    return %arg1, %arg0, %c0_i32 : i32, i32, i32
  }
}

module attributes {stable_mosaic.version = 11 : i64} {
  func.func @_matmul_bias_acc_kernel(%arg0: i32, %arg1: i32, %arg2: i32, %arg3: memref<64x256xbf16, #tpu.memory_space<vmem>>, %arg4: memref<256x512xbf16, #tpu.memory_space<vmem>>, %arg5: memref<1x512xf32, #tpu.memory_space<vmem>>, %arg6: memref<64x512xbf16, #tpu.memory_space<vmem>>, %arg7: memref<64x512xf32, #tpu.memory_space<vmem>>) attributes {dimension_semantics = [#tpu.dimension_semantics<parallel>, #tpu.dimension_semantics<parallel>, #tpu.dimension_semantics<arbitrary>], iteration_bounds = array<i64: 1, 1, 1>, scalar_prefetch = 0 : i64, scratch_operands = 1 : i64, tpu.core_type = #tpu.core_type<tc>, window_params = [{transform_indices = @transform_0, window_bounds = array<i64: 64, 256>}, {transform_indices = @transform_1, window_bounds = array<i64: 256, 512>}, {transform_indices = @transform_2, window_bounds = array<i64: 1, 512>}, {transform_indices = @transform_3, window_bounds = array<i64: 64, 512>}]} {
    %c0_i32 = arith.constant 0 : i32
    %0 = arith.cmpi eq, %arg2, %c0_i32 : i32
    %1 = arith.extui %0 : i1 to i32
    %c0_i32_0 = arith.constant 0 : i32
    %2 = arith.cmpi ne, %1, %c0_i32_0 : i32
    scf.if %2 {
      %cst_10 = arith.constant 0.000000e+00 : f32
      %12 = vector.broadcast %cst_10 : f32 to vector<64x512xf32>
      %c0_11 = arith.constant 0 : index
      %c0_12 = arith.constant 0 : index
      %13 = vector.load %arg7[%c0_11, %c0_12] : memref<64x512xf32, #tpu.memory_space<vmem>>, vector<64x512xf32>
      tpu.vector_store %arg7[%c0_11, %c0_12], %12 {strides = array<i32>} : memref<64x512xf32, #tpu.memory_space<vmem>>, vector<64x512xf32>,
    } else {
    }
    %c0 = arith.constant 0 : index
    %c0_1 = arith.constant 0 : index
    %3 = vector.load %arg7[%c0, %c0_1] : memref<64x512xf32, #tpu.memory_space<vmem>>, vector<64x512xf32>
    %c0_2 = arith.constant 0 : index
    %c0_3 = arith.constant 0 : index
    %4 = vector.load %arg3[%c0_2, %c0_3] : memref<64x256xbf16, #tpu.memory_space<vmem>>, vector<64x256xbf16>
    %c0_4 = arith.constant 0 : index
    %c0_5 = arith.constant 0 : index
    %5 = vector.load %arg4[%c0_4, %c0_5] : memref<256x512xbf16, #tpu.memory_space<vmem>>, vector<256x512xbf16>
    %cst = arith.constant dense<0.000000e+00> : vector<64x512xf32>
    %6 = tpu.matmul %4, %5, %cst {dimension_numbers = #tpu.dot_dimension_numbers<[1], [0], [0], [1], [0, 0, 1, 1], [], []>} : vector<64x256xbf16>, vector<256x512xbf16>, vector<64x512xf32> -> vector<64x512xf32>
    %7 = arith.addf %3, %6 : vector<64x512xf32>
    %c0_6 = arith.constant 0 : index
    %c0_7 = arith.constant 0 : index
    %8 = vector.load %arg7[%c0_6, %c0_7] : memref<64x512xf32, #tpu.memory_space<vmem>>, vector<64x512xf32>
    tpu.vector_store %arg7[%c0_6, %c0_7], %7 {strides = array<i32>} : memref<64x512xf32, #tpu.memory_space<vmem>>, vector<64x512xf32>,
    %c0_i32_8 = arith.constant 0 : i32
    %9 = arith.cmpi eq, %arg2, %c0_i32_8 : i32
    %10 = arith.extui %9 : i1 to i32
    %c0_i32_9 = arith.constant 0 : i32
    %11 = arith.cmpi ne, %10, %c0_i32_9 : i32
    scf.if %11 {
      %c0_10 = arith.constant 0 : index
      %c0_11 = arith.constant 0 : index
      %12 = vector.load %arg7[%c0_10, %c0_11] : memref<64x512xf32, #tpu.memory_space<vmem>>, vector<64x512xf32>
      %c0_12 = arith.constant 0 : index
      %c0_13 = arith.constant 0 : index
      %13 = vector.load %arg5[%c0_12, %c0_13] : memref<1x512xf32, #tpu.memory_space<vmem>>, vector<1x512xf32>
      %14 = vector.broadcast %13 : vector<1x512xf32> to vector<64x512xf32>
      %15 = arith.addf %12, %14 : vector<64x512xf32>
      %16 = arith.truncf %15 : vector<64x512xf32> to vector<64x512xbf16>
      %c0_14 = arith.constant 0 : index
      %c0_15 = arith.constant 0 : index
      %17 = vector.load %arg6[%c0_14, %c0_15] : memref<64x512xbf16, #tpu.memory_space<vmem>>, vector<64x512xbf16>
      tpu.vector_store %arg6[%c0_14, %c0_15], %16 {strides = array<i32>} : memref<64x512xbf16, #tpu.memory_space<vmem>>, vector<64x512xbf16>,
    } else {
    }
    return
  }
  func.func @transform_0(%arg0: i32, %arg1: i32, %arg2: i32) -> (i32, i32) {
    %c0_i32 = arith.constant 0 : i32
    return %arg0, %arg2 : i32, i32
  }
  func.func @transform_1(%arg0: i32, %arg1: i32, %arg2: i32) -> (i32, i32) {
    %c0_i32 = arith.constant 0 : i32
    return %arg2, %arg1 : i32, i32
  }
  func.func @transform_2(%arg0: i32, %arg1: i32, %arg2: i32) -> (i32, i32) {
    %c0_i32 = arith.constant 0 : i32
    %c0_i32_0 = arith.constant 0 : i32
    return %c0_i32, %arg1 : i32, i32
  }
  func.func @transform_3(%arg0: i32, %arg1: i32, %arg2: i32) -> (i32, i32) {
    %c0_i32 = arith.constant 0 : i32
    return %arg0, %arg1 : i32, i32
  }
}

</mosaic_0001>

<bundles_post_ra>
// kernel: decoder_rnn_forward.4
= control target key start
LH: loop header
LB: loop body
LE: loop exit
PB: predicated region body
PF: predicated region fallthrough
CT: control target
= control target key end

     0   :  { %s1516_s9 = smov 0   ;;  %s1518_s10 = smov 0   ;;  %s1954_s0 = inlined_call_operand.vmem [shape: bf16[8,8,1024], index: 0, kind: input, shape index: {}]   ;;  %s1955_s1 = inlined_call_operand.vmem [shape: bf16[256,1024], index: 1, kind: input, shape index: {}]   ;;  %s1956_s2 = inlined_call_operand.vmem [shape: bf16[8,8,256], index: 2, kind: output, shape index: {}]  }
   0x1   :  { %s1520_s11 = smov 0  }
   0x2 LB: > { %s21_s12 = sadd.s32 1, %s1494_s10  ;;  %p1291_p0 = scmp.ge.s32.totalorder %s1498_s11, 1  ;;  %s1498_s11 = sphi %s1520_s11, %s12_s11   ;;  %s1494_s10 = sphi %s1518_s10, %s1958_s10   ;;  %s1490_s9 = sphi %s1516_s9, %s1957_s9  }
   0x3   : > { %p22_p1 = scmp.ge.s32.totalorder %s21_s12, 8  ;;  %p132_p2 = scmp.lt.s32.totalorder %s1498_s11, 9 }
   0x5   : > { %s1960_s12 = smov (%p22_p1, %s21_s12), 0  ;;  %p133_p3 = pnand %p1291_p0, %p132_p2 }
   0x6   : > { %p162_p4 = scmp.lt.s32.totalorder (!%p133_p3), %s1490_s9, 7  ;;  %p1296_p5 = scmp.ne.s32.totalorder (!%p133_p3), %s1490_s9, 0 }
   0x7   : > { %136 = sbr.rel (%p133_p3) target bundleno = 400 (0x190), region = 28 }
   0xe   : > { %s163_s13 = scalar_select %p162_p4, %s1490_s9, 7 }
   0xf   : > { %183 = sbr.rel (%p1296_p5) target bundleno = 22 (0x16), region = 32  ;;  %v1500_v0 = vmov (!%p1296_p5), 0.0  }
  0x10   : > { %s1428_s14 = sshll.u32 %s163_s13, 5  ;;  %s1429_s15 = sshll.u32 %s163_s13, 3  ;;  %184 = vst [vmem:[#allocation2] sm:$0xff] (!%p1296_p5), %v1500_v0  ;;  %185 = vst [vmem:[#allocation2 + $0x8] sm:$0xff] (!%p1296_p5), %v1500_v0 }
  0x11   : > { %s1537_s18 = scalar_lea.vmem %s1954_s0, %s1428_s14  ;;  %s1542_s21 = scalar_lea.vmem %s1956_s2, %s1429_s15  ;;  %186 = vst [vmem:[#allocation3] sm:$0xff] (!%p1296_p5), %v1500_v0  ;;  %187 = vst [vmem:[#allocation3 + $0x8] sm:$0xff] (!%p1296_p5), %v1500_v0 }
  0x16 PF: > { %v204_v1 = vld [vmem:[%s1955_s1] sm:$0xff]  ;;  %v205_v7 = vld [vmem:[%s1955_s1 + $0x8] sm:$0xff] }
  0x17   : > { %v208_v2 = vld [vmem:[%s1955_s1 + $0x20] sm:$0xff]  ;;  %v209_v8 = vld [vmem:[%s1955_s1 + $0x28] sm:$0xff] }
  0x18   : > { %v212_v3 = vld [vmem:[%s1955_s1 + $0x40] sm:$0xff]  ;;  %v1298_v4 = vcombine.high %v204_v1, %v208_v2  ;;  %v1297_v5 = vcombine.low %v204_v1, %v208_v2  ;;  %v1300_v10 = vcombine.high %v205_v7, %v209_v8  ;;  %v1299_v11 = vcombine.low %v205_v7, %v209_v8  ;;  %v213_v14 = vld [vmem:[%s1955_s1 + $0x48] sm:$0xff] }
  0x19   : > { %v216_v6 = vld [vmem:[%s1955_s1 + $0x60] sm:$0xff]  ;;  %v217_v15 = vld [vmem:[%s1955_s1 + $0x68] sm:$0xff] }
  0x1a   : > { %v1306_v9 = vcombine.high %v212_v3, %v216_v6  ;;  %v220_v12 = vld [vmem:[%s1955_s1 + $0x80] sm:$0xff]  ;;  %972 = vmatprep.subr.bf16.mxu0 %v1298_v4  ;;  %v1305_v16 = vcombine.low %v212_v3, %v216_v6  ;;  %1013 = vmatprep.subr.bf16.mxu1 %v1300_v10  ;;  %v1308_v17 = vcombine.high %v213_v14, %v217_v15  ;;  %v221_v18 = vld [vmem:[%s1955_s1 + $0x88] sm:$0xff] }
  0x1b   : > { %v224_v13 = vld [vmem:[%s1955_s1 + $0xa0] sm:$0xff]  ;;  %973 = vmatpush1.bf16.msra.mxu0 %v1297_v5  ;;  %v225_v19 = vld [vmem:[%s1955_s1 + $0xa8] sm:$0xff]  ;;  %1014 = vmatpush1.bf16.msra.mxu1 %v1299_v11  ;;  %v1307_v21 = vcombine.low %v213_v14, %v217_v15 }
  0x1c   : > { %974 = vmatprep.subr.bf16.mxu0 %v1306_v9  ;;  %v1314_v20 = vcombine.high %v220_v12, %v224_v13  ;;  %1015 = vmatprep.subr.bf16.mxu1 %v1308_v17  ;;  %v228_v22 = vld [vmem:[%s1955_s1 + $0xc0] sm:$0xff]  ;;  %v1316_v24 = vcombine.high %v221_v18, %v225_v19  ;;  %v229_v25 = vld [vmem:[%s1955_s1 + $0xc8] sm:$0xff]  ;;  %v1313_v27 = vcombine.low %v220_v12, %v224_v13 }
  0x1d   : > { %v232_v23 = vld [vmem:[%s1955_s1 + $0xe0] sm:$0xff]  ;;  %v233_v26 = vld [vmem:[%s1955_s1 + $0xe8] sm:$0xff]  ;;  %v1315_v29 = vcombine.low %v221_v18, %v225_v19 }
  0x1e   : > { %v1322_v28 = vcombine.high %v228_v22, %v232_v23  ;;  %v236_v30 = vld [vmem:[%s1955_s1 + $0x100] sm:$0xff]  ;;  %v1324_v32 = vcombine.high %v229_v25, %v233_v26  ;;  %v237_v33 = vld [vmem:[%s1955_s1 + $0x108] sm:$0xff]  ;;  %v1321_v35 = vcombine.low %v228_v22, %v232_v23  ;;  %v1323_v37 = vcombine.low %v229_v25, %v233_v26 }
  0x1f   : > { %975 = vmatpush1.bf16.msra.mxu0 %v1305_v16  ;;  %1016 = vmatpush1.bf16.msra.mxu1 %v1307_v21  ;;  %v240_v31 = vld [vmem:[%s1955_s1 + $0x120] sm:$0xff]  ;;  %v241_v34 = vld [vmem:[%s1955_s1 + $0x128] sm:$0xff] }
  0x20   : > { %976 = vmatprep.subr.bf16.mxu0 %v1314_v20  ;;  %1017 = vmatprep.subr.bf16.mxu1 %v1316_v24  ;;  %v1330_v36 = vcombine.high %v236_v30, %v240_v31  ;;  %v244_v38 = vld [vmem:[%s1955_s1 + $0x140] sm:$0xff]  ;;  %v1332_v40 = vcombine.high %v237_v33, %v241_v34  ;;  %v245_v41 = vld [vmem:[%s1955_s1 + $0x148] sm:$0xff]  ;;  %v1329_v43 = vcombine.low %v236_v30, %v240_v31 }
  0x21   : > { %v248_v39 = vld [vmem:[%s1955_s1 + $0x160] sm:$0xff]  ;;  %v249_v42 = vld [vmem:[%s1955_s1 + $0x168] sm:$0xff]  ;;  %v1331_v45 = vcombine.low %v237_v33, %v241_v34 }
  0x22   : > { %v1338_v44 = vcombine.high %v244_v38, %v248_v39  ;;  %v252_v46 = vld [vmem:[%s1955_s1 + $0x180] sm:$0xff]  ;;  %v1340_v48 = vcombine.high %v245_v41, %v249_v42  ;;  %v253_v49 = vld [vmem:[%s1955_s1 + $0x188] sm:$0xff]  ;;  %v1337_v51 = vcombine.low %v244_v38, %v248_v39  ;;  %v1339_v54 = vcombine.low %v245_v41, %v249_v42 }
  0x23   : > { %977 = vmatpush1.bf16.msra.mxu0 %v1313_v27  ;;  %1018 = vmatpush1.bf16.msra.mxu1 %v1315_v29  ;;  %v256_v47 = vld [vmem:[%s1955_s1 + $0x1a0] sm:$0xff]  ;;  %v257_v50 = vld [vmem:[%s1955_s1 + $0x1a8] sm:$0xff] }
  0x24   : > { %978 = vmatprep.subr.bf16.mxu0 %v1322_v28  ;;  %1019 = vmatprep.subr.bf16.mxu1 %v1324_v32  ;;  %v201_v52 = vld [vmem:[#allocation2 + $0x8] sm:$0xff]  ;;  %v1346_v53 = vcombine.high %v252_v46, %v256_v47  ;;  %v260_v56 = vld [vmem:[%s1955_s1 + $0x1c0] sm:$0xff]  ;;  %v1348_v58 = vcombine.high %v253_v49, %v257_v50  ;;  %v1345_v61 = vcombine.low %v252_v46, %v256_v47 }
  0x25   : > { %v1628_v55 = vpack.c.bf16 %v201_v52, %v201_v52  ;;  %v264_v57 = vld [vmem:[%s1955_s1 + $0x1e0] sm:$0xff]  ;;  %v261_v59 = vld [vmem:[%s1955_s1 + $0x1c8] sm:$0xff]  ;;  %v1347_v63 = vcombine.low %v253_v49, %v257_v50 }
  0x26   : > { %v265_v60 = vld [vmem:[%s1955_s1 + $0x1e8] sm:$0xff]  ;;  %v1354_v62 = vcombine.high %v260_v56, %v264_v57  ;;  %v268_v0 = vld [vmem:[%s1955_s1 + $0x200] sm:$0xff]  ;;  %v1353_v5 = vcombine.low %v260_v56, %v264_v57 }
  0x27   : > { %979 = vmatpush1.bf16.msra.mxu0 %v1321_v35  ;;  %1020 = vmatpush1.bf16.msra.mxu1 %v1323_v37  ;;  %v272_v1 = vld [vmem:[%s1955_s1 + $0x220] sm:$0xff]  ;;  %v1356_v2 = vcombine.high %v261_v59, %v265_v60  ;;  %v269_v3 = vld [vmem:[%s1955_s1 + $0x208] sm:$0xff]  ;;  %v1355_v7 = vcombine.low %v261_v59, %v265_v60 }
  0x28   : > { %980 = vmatprep.subr.bf16.mxu0 %v1330_v36  ;;  %1021 = vmatprep.subr.bf16.mxu1 %v1332_v40  ;;  %v273_v4 = vld [vmem:[%s1955_s1 + $0x228] sm:$0xff]  ;;  %v1362_v6 = vcombine.high %v268_v0, %v272_v1  ;;  %v276_v8 = vld [vmem:[%s1955_s1 + $0x240] sm:$0xff]  ;;  %v1361_v13 = vcombine.low %v268_v0, %v272_v1  ;;  %v206_v1 = vld [vmem:[%s1955_s1 + $0x10] sm:$0xff] }
  0x29   : > { %1004 = vmatprep.mubr.bf16.mxu0 %v1628_v55  ;;  %1045 = vmatprep.mubr.bf16.mxu1 %v1628_v55  ;;  %v280_v9 = vld [vmem:[%s1955_s1 + $0x260] sm:$0xff]  ;;  %v1364_v10 = vcombine.high %v269_v3, %v273_v4  ;;  %v277_v11 = vld [vmem:[%s1955_s1 + $0x248] sm:$0xff]  ;;  %v1363_v15 = vcombine.low %v269_v3, %v273_v4  ;;  %v207_v4 = vld [vmem:[%s1955_s1 + $0x18] sm:$0xff] }
  0x2a   : > { %v281_v12 = vld [vmem:[%s1955_s1 + $0x268] sm:$0xff]  ;;  %v1370_v14 = vcombine.high %v276_v8, %v280_v9  ;;  %v284_v16 = vld [vmem:[%s1955_s1 + $0x280] sm:$0xff]  ;;  %v1369_v21 = vcombine.low %v276_v8, %v280_v9 }
  0x2b   : > { %981 = vmatpush1.bf16.msra.mxu0 %v1329_v43  ;;  %1022 = vmatpush1.bf16.msra.mxu1 %v1331_v45  ;;  %v288_v17 = vld [vmem:[%s1955_s1 + $0x2a0] sm:$0xff]  ;;  %v1372_v18 = vcombine.high %v277_v11, %v281_v12  ;;  %v285_v19 = vld [vmem:[%s1955_s1 + $0x288] sm:$0xff]  ;;  %v1371_v23 = vcombine.low %v277_v11, %v281_v12  ;;  %v218_v11 = vld [vmem:[%s1955_s1 + $0x70] sm:$0xff] }
  0x2c   : > { %982 = vmatprep.subr.bf16.mxu0 %v1338_v44  ;;  %1023 = vmatprep.subr.bf16.mxu1 %v1340_v48  ;;  %v289_v20 = vld [vmem:[%s1955_s1 + $0x2a8] sm:$0xff]  ;;  %v1378_v22 = vcombine.high %v284_v16, %v288_v17  ;;  %v292_v24 = vld [vmem:[%s1955_s1 + $0x2c0] sm:$0xff]  ;;  %v1377_v29 = vcombine.low %v284_v16, %v288_v17 }
  0x2d   : > { %v296_v25 = vld [vmem:[%s1955_s1 + $0x2e0] sm:$0xff]  ;;  %v1380_v26 = vcombine.high %v285_v19, %v289_v20  ;;  %v293_v27 = vld [vmem:[%s1955_s1 + $0x2c8] sm:$0xff]  ;;  %v1379_v31 = vcombine.low %v285_v19, %v289_v20  ;;  %v222_v19 = vld [vmem:[%s1955_s1 + $0x90] sm:$0xff] }
  0x2e   : > { %v297_v28 = vld [vmem:[%s1955_s1 + $0x2e8] sm:$0xff]  ;;  %v1386_v30 = vcombine.high %v292_v24, %v296_v25  ;;  %v300_v32 = vld [vmem:[%s1955_s1 + $0x300] sm:$0xff]  ;;  %v1385_v37 = vcombine.low %v292_v24, %v296_v25  ;;  %v226_v20 = vld [vmem:[%s1955_s1 + $0xb0] sm:$0xff] }
  0x2f   : > { %983 = vmatpush1.bf16.msra.mxu0 %v1337_v51  ;;  %1024 = vmatpush1.bf16.msra.mxu1 %v1339_v54  ;;  %v304_v33 = vld [vmem:[%s1955_s1 + $0x320] sm:$0xff]  ;;  %v1388_v34 = vcombine.high %v293_v27, %v297_v28  ;;  %v301_v35 = vld [vmem:[%s1955_s1 + $0x308] sm:$0xff]  ;;  %v1387_v39 = vcombine.low %v293_v27, %v297_v28  ;;  %v1318_v25 = vcombine.high %v222_v19, %v226_v20  ;;  %v230_v27 = vld [vmem:[%s1955_s1 + $0xd0] sm:$0xff] }
  0x30   : > { %984 = vmatprep.subr.bf16.mxu0 %v1346_v53  ;;  %1025 = vmatprep.subr.bf16.mxu1 %v1348_v58  ;;  %v305_v36 = vld [vmem:[%s1955_s1 + $0x328] sm:$0xff]  ;;  %v1394_v38 = vcombine.high %v300_v32, %v304_v33  ;;  %v308_v40 = vld [vmem:[%s1955_s1 + $0x340] sm:$0xff]  ;;  %v1393_v45 = vcombine.low %v300_v32, %v304_v33  ;;  %v234_v28 = vld [vmem:[%s1955_s1 + $0xf0] sm:$0xff]  ;;  %v1317_v32 = vcombine.low %v222_v19, %v226_v20 }
  0x31   : > { %v312_v41 = vld [vmem:[%s1955_s1 + $0x360] sm:$0xff]  ;;  %v1396_v42 = vcombine.high %v301_v35, %v305_v36  ;;  %v309_v43 = vld [vmem:[%s1955_s1 + $0x348] sm:$0xff]  ;;  %v1395_v47 = vcombine.low %v301_v35, %v305_v36  ;;  %v1326_v33 = vcombine.high %v230_v27, %v234_v28  ;;  %v238_v35 = vld [vmem:[%s1955_s1 + $0x110] sm:$0xff] }
  0x32   : > { %v313_v44 = vld [vmem:[%s1955_s1 + $0x368] sm:$0xff]  ;;  %v1402_v46 = vcombine.high %v308_v40, %v312_v41  ;;  %v316_v48 = vld [vmem:[%s1955_s1 + $0x380] sm:$0xff]  ;;  %v1401_v53 = vcombine.low %v308_v40, %v312_v41  ;;  %v242_v36 = vld [vmem:[%s1955_s1 + $0x130] sm:$0xff] }
  0x33   : > { %985 = vmatpush1.bf16.msra.mxu0 %v1345_v61  ;;  %1026 = vmatpush1.bf16.msra.mxu1 %v1347_v63  ;;  %v320_v49 = vld [vmem:[%s1955_s1 + $0x3a0] sm:$0xff]  ;;  %v1404_v50 = vcombine.high %v309_v43, %v313_v44  ;;  %v317_v51 = vld [vmem:[%s1955_s1 + $0x388] sm:$0xff]  ;;  %v1403_v56 = vcombine.low %v309_v43, %v313_v44  ;;  %v1334_v40 = vcombine.high %v238_v35, %v242_v36  ;;  %v250_v43 = vld [vmem:[%s1955_s1 + $0x170] sm:$0xff] }
  0x34   : > { %986 = vmatprep.subr.bf16.mxu0 %v1354_v62  ;;  %1027 = vmatprep.subr.bf16.mxu1 %v1356_v2  ;;  %v321_v52 = vld [vmem:[%s1955_s1 + $0x3a8] sm:$0xff]  ;;  %v1410_v54 = vcombine.high %v316_v48, %v320_v49  ;;  %v324_v57 = vld [vmem:[%s1955_s1 + $0x3c0] sm:$0xff]  ;;  %v1409_v62 = vcombine.low %v316_v48, %v320_v49  ;;  %v210_v2 = vld [vmem:[%s1955_s1 + $0x30] sm:$0xff] }
  0x35   : > { %v328_v58 = vld [vmem:[%s1955_s1 + $0x3e0] sm:$0xff]  ;;  %v1412_v59 = vcombine.high %v317_v51, %v321_v52  ;;  %v325_v60 = vld [vmem:[%s1955_s1 + $0x3c8] sm:$0xff]  ;;  %v1411_v0 = vcombine.low %v317_v51, %v321_v52  ;;  %v1302_v8 = vcombine.high %v206_v1, %v210_v2  ;;  %v1301_v16 = vcombine.low %v206_v1, %v210_v2  ;;  %v258_v51 = vld [vmem:[%s1955_s1 + $0x1b0] sm:$0xff] }
  0x36   : > { %v329_v61 = vld [vmem:[%s1955_s1 + $0x3e8] sm:$0xff]  ;;  %v1418_v63 = vcombine.high %v324_v57, %v328_v58  ;;  %v286_v20 = vld [vmem:[%s1955_s1 + $0x290] sm:$0xff] }
  0x37   : > { %987 = vmatpush1.bf16.msra.mxu0 %v1353_v5  ;;  %1028 = vmatpush1.bf16.msra.mxu1 %v1355_v7  ;;  %v1420_v3 = vcombine.high %v325_v60, %v329_v61  ;;  %v211_v5 = vld [vmem:[%s1955_s1 + $0x38] sm:$0xff]  ;;  %v200_v7 = vld [vmem:[#allocation2] sm:$0xff]  ;;  %v1419_v9 = vcombine.low %v325_v60, %v329_v61  ;;  %v266_v60 = vld [vmem:[%s1955_s1 + $0x1f0] sm:$0xff] }
  0x38   : > { %988 = vmatprep.subr.bf16.mxu0 %v1362_v6  ;;  %1029 = vmatprep.subr.bf16.mxu1 %v1364_v10  ;;  %v1417_v6 = vcombine.low %v324_v57, %v328_v58  ;;  %v214_v10 = vld [vmem:[%s1955_s1 + $0x50] sm:$0xff]  ;;  %v1304_v12 = vcombine.high %v207_v4, %v211_v5 }
  0x39   : > { %v1310_v17 = vcombine.high %v214_v10, %v218_v11  ;;  %v1309_v24 = vcombine.low %v214_v10, %v218_v11  ;;  %v278_v11 = vld [vmem:[%s1955_s1 + $0x250] sm:$0xff] }
  0x3b   : > { %989 = vmatpush1.bf16.msra.mxu0 %v1361_v13  ;;  %1030 = vmatpush1.bf16.msra.mxu1 %v1363_v15  ;;  %v1758_v13 = vpack.c.bf16 %v200_v7, %v200_v7  ;;  %v219_v15 = vld [vmem:[%s1955_s1 + $0x78] sm:$0xff] }
  0x3c   : > { %990 = vmatprep.subr.bf16.mxu0 %v1370_v14  ;;  %1031 = vmatprep.subr.bf16.mxu1 %v1372_v18  ;;  %v215_v14 = vld [vmem:[%s1955_s1 + $0x58] sm:$0xff]  ;;  %v1303_v18 = vcombine.low %v207_v4, %v211_v5  ;;  %v274_v4 = vld [vmem:[%s1955_s1 + $0x230] sm:$0xff] }
  0x3d   : > { %v275_v7 = vld [vmem:[%s1955_s1 + $0x238] sm:$0xff] }
  0x3f   : > { %991 = vmatpush1.bf16.msra.mxu0 %v1369_v21  ;;  %1032 = vmatpush1.bf16.msra.mxu1 %v1371_v23  ;;  %v1312_v21 = vcombine.high %v215_v14, %v219_v15  ;;  %v227_v23 = vld [vmem:[%s1955_s1 + $0xb8] sm:$0xff] }
  0x40   : > { %992 = vmatprep.subr.bf16.mxu0 %v1378_v22  ;;  %1033 = vmatprep.subr.bf16.mxu1 %v1380_v26  ;;  %v223_v22 = vld [vmem:[%s1955_s1 + $0x98] sm:$0xff]  ;;  %v1311_v26 = vcombine.low %v215_v14, %v219_v15 }
  0x41   : > { %v279_v15 = vld [vmem:[%s1955_s1 + $0x258] sm:$0xff] }
  0x43   : > { %993 = vmatpush1.bf16.msra.mxu0 %v1377_v29  ;;  %1034 = vmatpush1.bf16.msra.mxu1 %v1379_v31  ;;  %v1320_v29 = vcombine.high %v223_v22, %v227_v23  ;;  %v235_v31 = vld [vmem:[%s1955_s1 + $0xf8] sm:$0xff] }
  0x44   : > { %994 = vmatprep.subr.bf16.mxu0 %v1386_v30  ;;  %1035 = vmatprep.subr.bf16.mxu1 %v1388_v34  ;;  %v231_v30 = vld [vmem:[%s1955_s1 + $0xd8] sm:$0xff]  ;;  %v1319_v34 = vcombine.low %v223_v22, %v227_v23 }
  0x45   : > { %v1327_v41 = vcombine.low %v231_v30, %v235_v31  ;;  %v287_v23 = vld [vmem:[%s1955_s1 + $0x298] sm:$0xff] }
  0x47   : > { %995 = vmatpush1.bf16.msra.mxu0 %v1385_v37  ;;  %1036 = vmatpush1.bf16.msra.mxu1 %v1387_v39  ;;  %v1328_v37 = vcombine.high %v231_v30, %v235_v31  ;;  %v1325_v39 = vcombine.low %v230_v27, %v234_v28  ;;  %v294_v28 = vld [vmem:[%s1955_s1 + $0x2d0] sm:$0xff]  ;;  %v295_v31 = vld [vmem:[%s1955_s1 + $0x2d8] sm:$0xff] }
  0x48   : > { %996 = vmatprep.subr.bf16.mxu0 %v1394_v38  ;;  %1037 = vmatprep.subr.bf16.mxu1 %v1396_v42  ;;  %v243_v38 = vld [vmem:[%s1955_s1 + $0x138] sm:$0xff]  ;;  %v246_v42 = vld [vmem:[%s1955_s1 + $0x150] sm:$0xff] }
  0x49   : > { %v1342_v48 = vcombine.high %v246_v42, %v250_v43 }
  0x4b   : > { %997 = vmatpush1.bf16.msra.mxu0 %v1393_v45  ;;  %1038 = vmatpush1.bf16.msra.mxu1 %v1395_v47  ;;  %v247_v45 = vld [vmem:[%s1955_s1 + $0x158] sm:$0xff]  ;;  %v1333_v47 = vcombine.low %v238_v35, %v242_v36  ;;  %v302_v36 = vld [vmem:[%s1955_s1 + $0x310] sm:$0xff] }
  0x4c   : > { %998 = vmatprep.subr.bf16.mxu0 %v1402_v46  ;;  %1039 = vmatprep.subr.bf16.mxu1 %v1404_v50  ;;  %v251_v46 = vld [vmem:[%s1955_s1 + $0x178] sm:$0xff]  ;;  %v254_v50 = vld [vmem:[%s1955_s1 + $0x190] sm:$0xff] }
  0x4d   : > { %v1344_v52 = vcombine.high %v247_v45, %v251_v46  ;;  %v1350_v57 = vcombine.high %v254_v50, %v258_v51  ;;  %v1343_v58 = vcombine.low %v247_v45, %v251_v46  ;;  %v311_v46 = vld [vmem:[%s1955_s1 + $0x358] sm:$0xff] }
  0x4f   : > { %999 = vmatpush1.bf16.msra.mxu0 %v1401_v53  ;;  %1040 = vmatpush1.bf16.msra.mxu1 %v1403_v56  ;;  %v255_v53 = vld [vmem:[%s1955_s1 + $0x198] sm:$0xff]  ;;  %v1341_v56 = vcombine.low %v246_v42, %v250_v43  ;;  %v310_v43 = vld [vmem:[%s1955_s1 + $0x350] sm:$0xff] }
  0x50   : > { %1000 = vmatprep.subr.bf16.mxu0 %v1410_v54  ;;  %1041 = vmatprep.subr.bf16.mxu1 %v1412_v59  ;;  %v259_v54 = vld [vmem:[%s1955_s1 + $0x1b8] sm:$0xff]  ;;  %v262_v59 = vld [vmem:[%s1955_s1 + $0x1d0] sm:$0xff] }
  0x51   : > { %v1352_v61 = vcombine.high %v255_v53, %v259_v54  ;;  %v1358_v1 = vcombine.high %v262_v59, %v266_v60  ;;  %v1351_v2 = vcombine.low %v255_v53, %v259_v54  ;;  %v319_v54 = vld [vmem:[%s1955_s1 + $0x398] sm:$0xff] }
  0x53   : > { %1001 = vmatpush1.bf16.msra.mxu0 %v1409_v62  ;;  %1042 = vmatpush1.bf16.msra.mxu1 %v1411_v0  ;;  %v263_v62 = vld [vmem:[%s1955_s1 + $0x1d8] sm:$0xff]  ;;  %v1349_v0 = vcombine.low %v254_v50, %v258_v51  ;;  %v318_v51 = vld [vmem:[%s1955_s1 + $0x390] sm:$0xff] }
  0x54   : > { %1002 = vmatprep.subr.bf16.mxu0 %v1418_v63  ;;  %1043 = vmatprep.subr.bf16.mxu1 %v1420_v3  ;;  %v267_v63 = vld [vmem:[%s1955_s1 + $0x1f8] sm:$0xff]  ;;  %v270_v3 = vld [vmem:[%s1955_s1 + $0x210] sm:$0xff] }
  0x55   : > { %v1360_v5 = vcombine.high %v263_v62, %v267_v63  ;;  %v1359_v10 = vcombine.low %v263_v62, %v267_v63  ;;  %v327_v63 = vld [vmem:[%s1955_s1 + $0x3d8] sm:$0xff] }
  0x57   : > { %1003 = vmatpush1.bf16.msra.mxu0 %v1417_v6  ;;  %1044 = vmatpush1.bf16.msra.mxu1 %v1419_v9  ;;  %v271_v6 = vld [vmem:[%s1955_s1 + $0x218] sm:$0xff]  ;;  %v1366_v9 = vcombine.high %v270_v3, %v274_v4 }
  0x58   : > { %1054 = vmatprep.subr.bf16.mxu0 %v1302_v8  ;;  %1095 = vmatprep.subr.bf16.mxu1 %v1304_v12  ;;  %v1357_v8 = vcombine.low %v262_v59, %v266_v60  ;;  %v282_v12 = vld [vmem:[%s1955_s1 + $0x270] sm:$0xff]  ;;  %v1368_v14 = vcombine.high %v271_v6, %v275_v7  ;;  %v1367_v19 = vcombine.low %v271_v6, %v275_v7 }
  0x59   : > { %v326_v60 = vld [vmem:[%s1955_s1 + $0x3d0] sm:$0xff] }
  0x5a   : > { %1005 = vmatmul.mubr.bf16.vlgmr.msra.gmra.mrb[0].mxu0 %v1758_v13  ;;  %1046 = vmatmul.mubr.bf16.vlgmr.msra.gmra.mrb[0].mxu1 %v1758_v13 }
  0x5b   : > { %1055 = vmatpush1.bf16.msra.mxu0 %v1301_v16  ;;  %1096 = vmatpush1.bf16.msra.mxu1 %v1303_v18  ;;  %v283_v16 = vld [vmem:[%s1955_s1 + $0x278] sm:$0xff]  ;;  %v1374_v18 = vcombine.high %v278_v11, %v282_v12 }
  0x5c   : > { %1056 = vmatprep.subr.bf16.mxu0 %v1310_v17  ;;  %1097 = vmatprep.subr.bf16.mxu1 %v1312_v21  ;;  %v1365_v17 = vcombine.low %v270_v3, %v274_v4  ;;  %v290_v21 = vld [vmem:[%s1955_s1 + $0x2b0] sm:$0xff]  ;;  %v1376_v22 = vcombine.high %v279_v15, %v283_v16  ;;  %v1375_v27 = vcombine.low %v279_v15, %v283_v16  ;;  %v189_v16 = vld [vmem:[%s1537_s18 + $0x8] sm:$0xff] }
  0x5d   : > { %1086 = vmatprep.mubr.bf16.mxu0 %v1628_v55  ;;  %1127 = vmatprep.mubr.bf16.mxu1 %v1628_v55  ;;  %v239_v55 = vld [vmem:[%s1955_s1 + $0x118] sm:$0xff] }
  0x5e   : > { %v1336_v44 = vcombine.high %v239_v55, %v243_v38  ;;  %v1335_v49 = vcombine.low %v239_v55, %v243_v38  ;;  %v303_v38 = vld [vmem:[%s1955_s1 + $0x318] sm:$0xff] }
  0x5f   : > { %1057 = vmatpush1.bf16.msra.mxu0 %v1309_v24  ;;  %1098 = vmatpush1.bf16.msra.mxu1 %v1311_v26  ;;  %v291_v24 = vld [vmem:[%s1955_s1 + $0x2b8] sm:$0xff]  ;;  %v1382_v26 = vcombine.high %v286_v20, %v290_v21 }
  0x60   : > { %1058 = vmatprep.subr.bf16.mxu0 %v1318_v25  ;;  %1099 = vmatprep.subr.bf16.mxu1 %v1320_v29  ;;  %v1373_v25 = vcombine.low %v278_v11, %v282_v12  ;;  %v298_v29 = vld [vmem:[%s1955_s1 + $0x2f0] sm:$0xff]  ;;  %v1384_v30 = vcombine.high %v287_v23, %v291_v24  ;;  %v1383_v35 = vcombine.low %v287_v23, %v291_v24 }
  0x63   : > { %1059 = vmatpush1.bf16.msra.mxu0 %v1317_v32  ;;  %1100 = vmatpush1.bf16.msra.mxu1 %v1319_v34  ;;  %v299_v32 = vld [vmem:[%s1955_s1 + $0x2f8] sm:$0xff]  ;;  %v1390_v34 = vcombine.high %v294_v28, %v298_v29 }
  0x64   : > { %1060 = vmatprep.subr.bf16.mxu0 %v1326_v33  ;;  %1101 = vmatprep.subr.bf16.mxu1 %v1328_v37  ;;  %v1381_v33 = vcombine.low %v286_v20, %v290_v21  ;;  %v306_v37 = vld [vmem:[%s1955_s1 + $0x330] sm:$0xff]  ;;  %v1392_v55 = vcombine.high %v295_v31, %v299_v32  ;;  %v1391_v42 = vcombine.low %v295_v31, %v299_v32 }
  0x67   : > { %1061 = vmatpush1.bf16.msra.mxu0 %v1325_v39  ;;  %1102 = vmatpush1.bf16.msra.mxu1 %v1327_v41  ;;  %v307_v39 = vld [vmem:[%s1955_s1 + $0x338] sm:$0xff]  ;;  %v1398_v41 = vcombine.high %v302_v36, %v306_v37 }
  0x68   : > { %1062 = vmatprep.subr.bf16.mxu0 %v1334_v40  ;;  %1103 = vmatprep.subr.bf16.mxu1 %v1336_v44  ;;  %v1389_v40 = vcombine.low %v294_v28, %v298_v29  ;;  %v314_v44 = vld [vmem:[%s1955_s1 + $0x370] sm:$0xff]  ;;  %v1400_v45 = vcombine.high %v303_v38, %v307_v39  ;;  %v1399_v50 = vcombine.low %v303_v38, %v307_v39 }
  0x69   : > { %v190_v29 = vld [vmem:[%s1537_s18 + $0x10] sm:$0xff] }
  0x6a   : > { %v196_v31 = vunpack.c.l.bf16 %v190_v29  ;;  %v197_v32 = vunpack.c.h.bf16 %v190_v29 }
  0x6b   : > { %1063 = vmatpush1.bf16.msra.mxu0 %v1333_v47  ;;  %1104 = vmatpush1.bf16.msra.mxu1 %v1335_v49  ;;  %v315_v47 = vld [vmem:[%s1955_s1 + $0x378] sm:$0xff]  ;;  %v1406_v49 = vcombine.high %v310_v43, %v314_v44 }
  0x6c   : > { %1064 = vmatprep.subr.bf16.mxu0 %v1342_v48  ;;  %1105 = vmatprep.subr.bf16.mxu1 %v1344_v52  ;;  %v1397_v48 = vcombine.low %v302_v36, %v306_v37  ;;  %v322_v52 = vld [vmem:[%s1955_s1 + $0x3b0] sm:$0xff]  ;;  %v1408_v53 = vcombine.high %v311_v46, %v315_v47  ;;  %v1407_v59 = vcombine.low %v311_v46, %v315_v47 }
  0x6f   : > { %1065 = vmatpush1.bf16.msra.mxu0 %v1341_v56  ;;  %1106 = vmatpush1.bf16.msra.mxu1 %v1343_v58  ;;  %v323_v56 = vld [vmem:[%s1955_s1 + $0x3b8] sm:$0xff]  ;;  %v1414_v58 = vcombine.high %v318_v51, %v322_v52 }
  0x70   : > { %1066 = vmatprep.subr.bf16.mxu0 %v1350_v57  ;;  %1107 = vmatprep.subr.bf16.mxu1 %v1352_v61  ;;  %v1405_v57 = vcombine.low %v310_v43, %v314_v44  ;;  %v330_v61 = vld [vmem:[%s1955_s1 + $0x3f0] sm:$0xff]  ;;  %v1416_v62 = vcombine.high %v319_v54, %v323_v56  ;;  %v1415_v3 = vcombine.low %v319_v54, %v323_v56 }
  0x73   : > { %1067 = vmatpush1.bf16.msra.mxu0 %v1349_v0  ;;  %1108 = vmatpush1.bf16.msra.mxu1 %v1351_v2  ;;  %v331_v0 = vld [vmem:[%s1955_s1 + $0x3f8] sm:$0xff]  ;;  %v1422_v2 = vcombine.high %v326_v60, %v330_v61 }
  0x74   : > { %1068 = vmatprep.subr.bf16.mxu0 %v1358_v1  ;;  %1109 = vmatprep.subr.bf16.mxu1 %v1360_v5  ;;  %v1413_v1 = vcombine.low %v318_v51, %v322_v52  ;;  %v1424_v4 = vcombine.high %v327_v63, %v331_v0  ;;  %v1421_v5 = vcombine.low %v326_v60, %v330_v61  ;;  %v1171_v61 = vld [vmem:[#allocation3 + $0x8] sm:$0xff] }
  0x75   : > { %v1423_v6 = vcombine.low %v327_v63, %v331_v0 }
  0x77   : > { %1069 = vmatpush1.bf16.msra.mxu0 %v1357_v8  ;;  %1110 = vmatpush1.bf16.msra.mxu1 %v1359_v10 }
  0x78   : > { %1070 = vmatprep.subr.bf16.mxu0 %v1366_v9  ;;  %1111 = vmatprep.subr.bf16.mxu1 %v1368_v14 }
  0x7b   : > { %1071 = vmatpush1.bf16.msra.mxu0 %v1365_v17  ;;  %1112 = vmatpush1.bf16.msra.mxu1 %v1367_v19  ;;  %v188_v17 = vld [vmem:[%s1537_s18] sm:$0xff]  ;;  %v195_v19 = vunpack.c.h.bf16 %v189_v16 }
  0x7c   : > { %1072 = vmatprep.subr.bf16.mxu0 %v1374_v18  ;;  %1113 = vmatprep.subr.bf16.mxu1 %v1376_v22  ;;  %v194_v18 = vunpack.c.l.bf16 %v189_v16  ;;  %v192_v20 = vunpack.c.l.bf16 %v188_v17  ;;  %v193_v21 = vunpack.c.h.bf16 %v188_v17 }
  0x7f   : > { %1073 = vmatpush1.bf16.msra.mxu0 %v1373_v25  ;;  %1114 = vmatpush1.bf16.msra.mxu1 %v1375_v27 }
  0x80   : > { %1074 = vmatprep.subr.bf16.mxu0 %v1382_v26  ;;  %1115 = vmatprep.subr.bf16.mxu1 %v1384_v30  ;;  %v191_v30 = vld [vmem:[%s1537_s18 + $0x18] sm:$0xff] }
  0x83   : > { %1075 = vmatpush1.bf16.msra.mxu0 %v1381_v33  ;;  %1116 = vmatpush1.bf16.msra.mxu1 %v1383_v35  ;;  %v198_v33 = vunpack.c.l.bf16 %v191_v30 }
  0x84   : > { %1076 = vmatprep.subr.bf16.mxu0 %v1390_v34  ;;  %1117 = vmatprep.subr.bf16.mxu1 %v1392_v55  ;;  %v199_v34 = vunpack.c.h.bf16 %v191_v30 }
  0x87   : > { %1077 = vmatpush1.bf16.msra.mxu0 %v1389_v40  ;;  %1118 = vmatpush1.bf16.msra.mxu1 %v1391_v42 }
  0x88   : > { %1078 = vmatprep.subr.bf16.mxu0 %v1398_v41  ;;  %1119 = vmatprep.subr.bf16.mxu1 %v1400_v45 }
  0x8b   : > { %1079 = vmatpush1.bf16.msra.mxu0 %v1397_v48  ;;  %1120 = vmatpush1.bf16.msra.mxu1 %v1399_v50 }
  0x8c   : > { %1080 = vmatprep.subr.bf16.mxu0 %v1406_v49  ;;  %1121 = vmatprep.subr.bf16.mxu1 %v1408_v53 }
  0x8f   : > { %1081 = vmatpush1.bf16.msra.mxu0 %v1405_v57  ;;  %1122 = vmatpush1.bf16.msra.mxu1 %v1407_v59 }
  0x90   : > { %1082 = vmatprep.subr.bf16.mxu0 %v1414_v58  ;;  %1123 = vmatprep.subr.bf16.mxu1 %v1416_v62  ;;  %v1170_v58 = vld [vmem:[#allocation3] sm:$0xff] }
  0x93   : > { %1083 = vmatpush1.bf16.msra.mxu0 %v1413_v1  ;;  %1124 = vmatpush1.bf16.msra.mxu1 %v1415_v3 }
  0x94   : > { %1084 = vmatprep.subr.bf16.mxu0 %v1422_v2  ;;  %1125 = vmatprep.subr.bf16.mxu1 %v1424_v4 }
  0x97   : > { %1085 = vmatpush1.bf16.msra.mxu0 %v1421_v5  ;;  %1126 = vmatpush1.bf16.msra.mxu1 %v1423_v6 }
  0x9a   : > { %1087 = vmatmul.mubr.bf16.vlgmr.msra.gmra.mrb[4].mxu0 %v1758_v13  ;;  %1128 = vmatmul.mubr.bf16.vlgmr.msra.gmra.mrb[4].mxu1 %v1758_v13 }
 0x12d   : > { %v1006_v7 = vpop.f32.mrb[0].mxu0  ;;  %v1047_v9 = vpop.f32.mrb[0].mxu1 }
 0x12e   : > { %v1008_v8 = vpop.f32.mrb[1].mxu0  ;;  %v1049_v11 = vpop.f32.mrb[1].mxu1  ;;  %v1138_v22 = vadd.f32 %v1047_v9, %v194_v18  ;;  %v1136_v24 = vadd.f32 %v1006_v7, %v192_v20 }
 0x12f   : > { %v1010_v10 = vpop.f32.mrb[2].mxu0  ;;  %v1051_v14 = vpop.f32.mrb[2].mxu1  ;;  %v1139_v23 = vadd.f32 %v1049_v11, %v195_v19  ;;  %v1137_v13 = vadd.f32 %v1008_v8, %v193_v21 }
 0x130   : > { %v1011_v12 = vpop.f32.mrb[3].mxu0  ;;  %v1052_v15 = vpop.f32.mrb[3].mxu1  ;;  %v1152_v25 = vmul.f32 0.5, %v1138_v22  ;;  %v1144_v27 = vmul.f32 0.5, %v1136_v24 }
 0x131   : > { %v1153_v26 = vmul.f32 0.5, %v1139_v23  ;;  %v1145_v28 = vmul.f32 0.5, %v1137_v13 }
 0x132   : > { %1456 = vtanh.f32 %v1152_v25 }
 0x133   : > { %1458 = vtanh.f32 %v1153_v26 }
 0x134   : > { %1460 = vtanh.f32 %v1144_v27 }
 0x135   : > { %1462 = vtanh.f32 %v1145_v28 }
 0x13c   : > { %v1457_v42 = vpop.eup %1456 }
 0x13d   : > { %v1459_v46 = vpop.eup %1458  ;;  %v1156_v52 = vadd.f32 1.0, %v1457_v42 }
 0x13e   : > { %v1461_v49 = vpop.eup %1460  ;;  %v1157_v53 = vadd.f32 1.0, %v1459_v46 }
 0x13f   : > { %v1463_v51 = vpop.eup %1462  ;;  %v1148_v54 = vadd.f32 1.0, %v1461_v49  ;;  %v1158_v57 = vmul.f32 0.5, %v1156_v52 }
 0x140   : > { %v1149_v56 = vadd.f32 1.0, %v1463_v51  ;;  %v1159_v59 = vmul.f32 0.5, %v1157_v53 }
 0x141   : > { %v1150_v60 = vmul.f32 0.5, %v1148_v54  ;;  %v1172_v1 = vmul.f32 %v1170_v58, %v1158_v57 }
 0x142   : > { %v1151_v63 = vmul.f32 0.5, %v1149_v56  ;;  %v1173_v3 = vmul.f32 %v1171_v61, %v1159_v59 }
 0x16d   : > { %v1088_v35 = vpop.f32.mrb[4].mxu0  ;;  %v1129_v55 = vpop.f32.mrb[4].mxu1 }
 0x16e   : > { %v1140_v36 = vadd.f32 %v1088_v35, %v196_v31  ;;  %v1090_v37 = vpop.f32.mrb[5].mxu0  ;;  %v1142_v40 = vadd.f32 %v1129_v55, %v198_v33  ;;  %v1131_v41 = vpop.f32.mrb[5].mxu1 }
 0x16f   : > { %v1141_v38 = vadd.f32 %v1090_v37, %v197_v32  ;;  %v1092_v39 = vpop.f32.mrb[6].mxu0  ;;  %v1143_v44 = vadd.f32 %v1131_v41, %v199_v34  ;;  %v1133_v45 = vpop.f32.mrb[6].mxu1 }
 0x170   : > { %1464 = vtanh.f32 %v1140_v36  ;;  %v1093_v43 = vpop.f32.mrb[7].mxu0  ;;  %v1162_v47 = vmul.f32 0.5, %v1142_v40  ;;  %v1134_v48 = vpop.f32.mrb[7].mxu1 }
 0x171   : > { %1466 = vtanh.f32 %v1141_v38  ;;  %v1163_v50 = vmul.f32 0.5, %v1143_v44 }
 0x172   : > { %1468 = vtanh.f32 %v1162_v47 }
 0x173   : > { %1470 = vtanh.f32 %v1163_v50 }
 0x17a   : > { %v1465_v62 = vpop.eup %1464 }
 0x17b   : > { %v1467_v0 = vpop.eup %1466  ;;  %v1174_v2 = vmul.f32 %v1465_v62, %v1150_v60 }
 0x17c   : > { %v1175_v4 = vmul.f32 %v1467_v0, %v1151_v63  ;;  %v1469_v7 = vpop.eup %1468 }
 0x17d   : > { %v1176_v5 = vadd.f32 %v1174_v2, %v1172_v1  ;;  %v1471_v8 = vpop.eup %1470  ;;  %v1166_v9 = vadd.f32 1.0, %v1469_v7 }
 0x17e   : > { %v1177_v6 = vadd.f32 %v1175_v4, %v1173_v3  ;;  %v1167_v10 = vadd.f32 1.0, %v1471_v8 }
 0x17f   : > { %1472 = vtanh.f32 %v1176_v5  ;;  %1184 = vst [vmem:[#allocation3] sm:$0xff] %v1176_v5  ;;  %v1168_v11 = vmul.f32 0.5, %v1166_v9 }
 0x180   : > { %1474 = vtanh.f32 %v1177_v6  ;;  %1185 = vst [vmem:[#allocation3 + $0x8] sm:$0xff] %v1177_v6  ;;  %v1169_v12 = vmul.f32 0.5, %v1167_v10 }
 0x189   : > { %v1473_v14 = vpop.eup %1472 }
 0x18a   : > { %v1475_v15 = vpop.eup %1474  ;;  %v1180_v16 = vmul.f32 %v1473_v14, %v1168_v11 }
 0x18b   : > { %v1181_v17 = vmul.f32 %v1475_v15, %v1169_v12 }
 0x18c   : > { %1182 = vst [vmem:[#allocation2] sm:$0xff] %v1180_v16 }
 0x18d   : > { %1183 = vst [vmem:[#allocation2 + $0x8] sm:$0xff] %v1181_v17  ;;  %v1430_v18 = vpack.c.bf16 %v1181_v17, %v1180_v16 }
 0x18f   : > { %1194 = vst [vmem:[%s1542_s21] sm:$0xff] %v1430_v18 }
 0x190 PF: > { %s12_s11 = sadd.s32 1, %s1498_s11   ;;  %s1957_s9 = smov %s1494_s10 }
 0x191   : > { %p9_p6 = scmp.ge.s32.totalorder %s12_s11, 10   ;;  %s1958_s10 = smov %s1960_s12 }
 0x193   :  { %11 = sbr.rel (!%p9_p6) target bundleno = 2 (0x2), region = 62 }

// kernel: decoder_rnn_forward.5
= control target key start
LH: loop header
LB: loop body
LE: loop exit
PB: predicated region body
PF: predicated region fallthrough
CT: control target
= control target key end

     0   :  { %s1475_s0 = inlined_call_operand.vmem [shape: bf16[64,256], index: 0, kind: input, shape index: {}]   ;;  %s1476_s1 = inlined_call_operand.vmem [shape: bf16[256,512], index: 1, kind: input, shape index: {}]   ;;  %s1477_s2 = inlined_call_operand.vmem [shape: f32[1,512], index: 2, kind: input, shape index: {}]   ;;  %s1478_s3 = inlined_call_operand.hbm [shape: bf16[64,512], index: 3, kind: output, shape index: {}]  }
   0x1   :  { %v1049_v0 = vld [vmem:[%s1476_s1 + $0x4] ss:$16 sps:$4 sm:$0xff]   ;;  %v1051_v1 = vld [vmem:[%s1476_s1 + $0xc] ss:$16 sps:$4 sm:$0xff]   ;;  %v1053_v2 = vld [vmem:[%s1476_s1] ss:$16 sps:$4 sm:$0xff]  }
   0x2   :  { %515 = vmatprep.subr.bf16.mxu0 %v1049_v0  ;;  %v1054_v3 = vld [vmem:[%s1476_s1 + $0x8] ss:$16 sps:$4 sm:$0xff]   ;;  %588 = vmatprep.subr.bf16.mxu1 %v1051_v1  ;;  %v1055_v4 = vld [vmem:[%s1476_s1 + $0x24] ss:$16 sps:$4 sm:$0xff]   ;;  %v1057_v5 = vld [vmem:[%s1476_s1 + $0x2c] ss:$16 sps:$4 sm:$0xff]  }
   0x3   :  { %516 = vmatpush1.bf16.msra.mxu0 %v1053_v2  ;;  %589 = vmatpush1.bf16.msra.mxu1 %v1054_v3  ;;  %v1059_v6 = vld [vmem:[%s1476_s1 + $0x20] ss:$16 sps:$4 sm:$0xff]   ;;  %v1060_v7 = vld [vmem:[%s1476_s1 + $0x28] ss:$16 sps:$4 sm:$0xff]   ;;  %v1061_v8 = vld [vmem:[%s1476_s1 + $0x44] ss:$16 sps:$4 sm:$0xff]  }
   0x4   :  { %517 = vmatprep.subr.bf16.mxu0 %v1055_v4  ;;  %590 = vmatprep.subr.bf16.mxu1 %v1057_v5  ;;  %v1063_v9 = vld [vmem:[%s1476_s1 + $0x4c] ss:$16 sps:$4 sm:$0xff]   ;;  %v1065_v10 = vld [vmem:[%s1476_s1 + $0x40] ss:$16 sps:$4 sm:$0xff]   ;;  %v1066_v11 = vld [vmem:[%s1476_s1 + $0x48] ss:$16 sps:$4 sm:$0xff]  }
   0x5   :  { %v1067_v12 = vld [vmem:[%s1476_s1 + $0x64] ss:$16 sps:$4 sm:$0xff]   ;;  %v1069_v13 = vld [vmem:[%s1476_s1 + $0x6c] ss:$16 sps:$4 sm:$0xff]   ;;  %v1071_v14 = vld [vmem:[%s1476_s1 + $0x60] ss:$16 sps:$4 sm:$0xff]  }
   0x6   :  { %v1072_v15 = vld [vmem:[%s1476_s1 + $0x68] ss:$16 sps:$4 sm:$0xff]   ;;  %v1073_v16 = vld [vmem:[%s1476_s1 + $0x84] ss:$16 sps:$4 sm:$0xff]   ;;  %v1075_v17 = vld [vmem:[%s1476_s1 + $0x8c] ss:$16 sps:$4 sm:$0xff]  }
   0x7   :  { %518 = vmatpush1.bf16.msra.mxu0 %v1059_v6  ;;  %591 = vmatpush1.bf16.msra.mxu1 %v1060_v7  ;;  %v1077_v18 = vld [vmem:[%s1476_s1 + $0x80] ss:$16 sps:$4 sm:$0xff]   ;;  %v1078_v19 = vld [vmem:[%s1476_s1 + $0x88] ss:$16 sps:$4 sm:$0xff]   ;;  %v1079_v20 = vld [vmem:[%s1476_s1 + $0xa4] ss:$16 sps:$4 sm:$0xff]  }
   0x8   :  { %519 = vmatprep.subr.bf16.mxu0 %v1061_v8  ;;  %592 = vmatprep.subr.bf16.mxu1 %v1063_v9  ;;  %v1081_v21 = vld [vmem:[%s1476_s1 + $0xac] ss:$16 sps:$4 sm:$0xff]   ;;  %v1083_v22 = vld [vmem:[%s1476_s1 + $0xa0] ss:$16 sps:$4 sm:$0xff]   ;;  %v1084_v23 = vld [vmem:[%s1476_s1 + $0xa8] ss:$16 sps:$4 sm:$0xff]  }
   0x9   :  { %v1085_v24 = vld [vmem:[%s1476_s1 + $0xc4] ss:$16 sps:$4 sm:$0xff]   ;;  %v1087_v25 = vld [vmem:[%s1476_s1 + $0xcc] ss:$16 sps:$4 sm:$0xff]   ;;  %v1089_v26 = vld [vmem:[%s1476_s1 + $0xc0] ss:$16 sps:$4 sm:$0xff]  }
   0xa   :  { %v1090_v27 = vld [vmem:[%s1476_s1 + $0xc8] ss:$16 sps:$4 sm:$0xff]   ;;  %v1091_v28 = vld [vmem:[%s1476_s1 + $0xe4] ss:$16 sps:$4 sm:$0xff]   ;;  %v1093_v29 = vld [vmem:[%s1476_s1 + $0xec] ss:$16 sps:$4 sm:$0xff]  }
   0xb   :  { %520 = vmatpush1.bf16.msra.mxu0 %v1065_v10  ;;  %593 = vmatpush1.bf16.msra.mxu1 %v1066_v11  ;;  %v1095_v30 = vld [vmem:[%s1476_s1 + $0xe0] ss:$16 sps:$4 sm:$0xff]   ;;  %v1096_v31 = vld [vmem:[%s1476_s1 + $0xe8] ss:$16 sps:$4 sm:$0xff]   ;;  %v1097_v32 = vld [vmem:[%s1476_s1 + $0x104] ss:$16 sps:$4 sm:$0xff]  }
   0xc   :  { %521 = vmatprep.subr.bf16.mxu0 %v1067_v12  ;;  %594 = vmatprep.subr.bf16.mxu1 %v1069_v13  ;;  %v1099_v33 = vld [vmem:[%s1476_s1 + $0x10c] ss:$16 sps:$4 sm:$0xff]   ;;  %v1101_v34 = vld [vmem:[%s1476_s1 + $0x100] ss:$16 sps:$4 sm:$0xff]   ;;  %v1102_v35 = vld [vmem:[%s1476_s1 + $0x108] ss:$16 sps:$4 sm:$0xff]  }
   0xd   :  { %v1103_v36 = vld [vmem:[%s1476_s1 + $0x124] ss:$16 sps:$4 sm:$0xff]   ;;  %v1105_v37 = vld [vmem:[%s1476_s1 + $0x12c] ss:$16 sps:$4 sm:$0xff]   ;;  %v1107_v38 = vld [vmem:[%s1476_s1 + $0x120] ss:$16 sps:$4 sm:$0xff]  }
   0xe   :  { %v1108_v39 = vld [vmem:[%s1476_s1 + $0x128] ss:$16 sps:$4 sm:$0xff]   ;;  %v1109_v40 = vld [vmem:[%s1476_s1 + $0x144] ss:$16 sps:$4 sm:$0xff]   ;;  %v1111_v41 = vld [vmem:[%s1476_s1 + $0x14c] ss:$16 sps:$4 sm:$0xff]  }
   0xf   :  { %522 = vmatpush1.bf16.msra.mxu0 %v1071_v14  ;;  %595 = vmatpush1.bf16.msra.mxu1 %v1072_v15  ;;  %v1113_v42 = vld [vmem:[%s1476_s1 + $0x140] ss:$16 sps:$4 sm:$0xff]   ;;  %v1114_v43 = vld [vmem:[%s1476_s1 + $0x148] ss:$16 sps:$4 sm:$0xff]   ;;  %v1115_v44 = vld [vmem:[%s1476_s1 + $0x164] ss:$16 sps:$4 sm:$0xff]  }
  0x10   :  { %523 = vmatprep.subr.bf16.mxu0 %v1073_v16  ;;  %596 = vmatprep.subr.bf16.mxu1 %v1075_v17  ;;  %v1117_v45 = vld [vmem:[%s1476_s1 + $0x16c] ss:$16 sps:$4 sm:$0xff]   ;;  %v1119_v46 = vld [vmem:[%s1476_s1 + $0x160] ss:$16 sps:$4 sm:$0xff]   ;;  %v1120_v47 = vld [vmem:[%s1476_s1 + $0x168] ss:$16 sps:$4 sm:$0xff]  }
  0x11   :  { %v1147_v48 = vld [vmem:[%s1475_s0 + $0x4] ss:$8 sps:$4 sm:$0xff]   ;;  %v1125_v51 = vld [vmem:[%s1476_s1 + $0x180] ss:$16 sps:$4 sm:$0xff]   ;;  %v1126_v52 = vld [vmem:[%s1476_s1 + $0x188] ss:$16 sps:$4 sm:$0xff]  }
  0x12   :  { %v1121_v49 = vld [vmem:[%s1476_s1 + $0x184] ss:$16 sps:$4 sm:$0xff]   ;;  %v1123_v50 = vld [vmem:[%s1476_s1 + $0x18c] ss:$16 sps:$4 sm:$0xff]   ;;  %547 = vmatprep.mubr.bf16.mxu0 %v1147_v48  ;;  %620 = vmatprep.mubr.bf16.mxu1 %v1147_v48 }
  0x13   :  { %524 = vmatpush1.bf16.msra.mxu0 %v1077_v18  ;;  %597 = vmatpush1.bf16.msra.mxu1 %v1078_v19 }
  0x14   :  { %525 = vmatprep.subr.bf16.mxu0 %v1079_v20  ;;  %598 = vmatprep.subr.bf16.mxu1 %v1081_v21 }
  0x17   :  { %526 = vmatpush1.bf16.msra.mxu0 %v1083_v22  ;;  %599 = vmatpush1.bf16.msra.mxu1 %v1084_v23 }
  0x18   :  { %527 = vmatprep.subr.bf16.mxu0 %v1085_v24  ;;  %600 = vmatprep.subr.bf16.mxu1 %v1087_v25 }
  0x1b   :  { %528 = vmatpush1.bf16.msra.mxu0 %v1089_v26  ;;  %601 = vmatpush1.bf16.msra.mxu1 %v1090_v27 }
  0x1c   :  { %529 = vmatprep.subr.bf16.mxu0 %v1091_v28  ;;  %602 = vmatprep.subr.bf16.mxu1 %v1093_v29 }
  0x1f   :  { %530 = vmatpush1.bf16.msra.mxu0 %v1095_v30  ;;  %603 = vmatpush1.bf16.msra.mxu1 %v1096_v31 }
  0x20   :  { %531 = vmatprep.subr.bf16.mxu0 %v1097_v32  ;;  %604 = vmatprep.subr.bf16.mxu1 %v1099_v33 }
  0x23   :  { %532 = vmatpush1.bf16.msra.mxu0 %v1101_v34  ;;  %605 = vmatpush1.bf16.msra.mxu1 %v1102_v35 }
  0x24   :  { %533 = vmatprep.subr.bf16.mxu0 %v1103_v36  ;;  %606 = vmatprep.subr.bf16.mxu1 %v1105_v37 }
  0x27   :  { %534 = vmatpush1.bf16.msra.mxu0 %v1107_v38  ;;  %607 = vmatpush1.bf16.msra.mxu1 %v1108_v39 }
  0x28   :  { %535 = vmatprep.subr.bf16.mxu0 %v1109_v40  ;;  %608 = vmatprep.subr.bf16.mxu1 %v1111_v41 }
  0x2b   :  { %536 = vmatpush1.bf16.msra.mxu0 %v1113_v42  ;;  %609 = vmatpush1.bf16.msra.mxu1 %v1114_v43 }
  0x2c   :  { %537 = vmatprep.subr.bf16.mxu0 %v1115_v44  ;;  %610 = vmatprep.subr.bf16.mxu1 %v1117_v45 }
  0x2f   :  { %538 = vmatpush1.bf16.msra.mxu0 %v1119_v46  ;;  %611 = vmatpush1.bf16.msra.mxu1 %v1120_v47 }
  0x30   :  { %8 = vsyncpa [#allocation4], 0  ;;  %539 = vmatprep.subr.bf16.mxu0 %v1121_v49  ;;  %612 = vmatprep.subr.bf16.mxu1 %v1123_v50  ;;  %v1127_v53 = vld [vmem:[%s1476_s1 + $0x1a4] ss:$16 sps:$4 sm:$0xff]   ;;  %v1129_v54 = vld [vmem:[%s1476_s1 + $0x1ac] ss:$16 sps:$4 sm:$0xff]   ;;  %v762_v8 = vlaneseq }
  0x31   :  { %v1131_v55 = vld [vmem:[%s1476_s1 + $0x1a0] ss:$16 sps:$4 sm:$0xff]   ;;  %v1132_v56 = vld [vmem:[%s1476_s1 + $0x1a8] ss:$16 sps:$4 sm:$0xff]   ;;  %v1133_v57 = vld [vmem:[%s1476_s1 + $0x1c4] ss:$16 sps:$4 sm:$0xff]  }
  0x32   :  { %v1135_v58 = vld [vmem:[%s1476_s1 + $0x1cc] ss:$16 sps:$4 sm:$0xff]   ;;  %v1137_v59 = vld [vmem:[%s1476_s1 + $0x1c0] ss:$16 sps:$4 sm:$0xff]   ;;  %v1138_v60 = vld [vmem:[%s1476_s1 + $0x1c8] ss:$16 sps:$4 sm:$0xff]  }
  0x33   :  { %540 = vmatpush1.bf16.msra.mxu0 %v1125_v51  ;;  %613 = vmatpush1.bf16.msra.mxu1 %v1126_v52  ;;  %v1139_v61 = vld [vmem:[%s1476_s1 + $0x1e4] ss:$16 sps:$4 sm:$0xff]   ;;  %v1141_v62 = vld [vmem:[%s1476_s1 + $0x1ec] ss:$16 sps:$4 sm:$0xff]   ;;  %v1143_v63 = vld [vmem:[%s1476_s1 + $0x1e0] ss:$16 sps:$4 sm:$0xff]  }
  0x34   :  { %541 = vmatprep.subr.bf16.mxu0 %v1127_v53  ;;  %614 = vmatprep.subr.bf16.mxu1 %v1129_v54  ;;  %v1144_v0 = vld [vmem:[%s1476_s1 + $0x1e8] ss:$16 sps:$4 sm:$0xff]   ;;  %v1148_v2 = vld [vmem:[%s1475_s0 + $0x14] ss:$8 sps:$4 sm:$0xff]   ;;  %v1151_v4 = vld [vmem:[%s1475_s0 + $0x24] ss:$8 sps:$4 sm:$0xff]  }
  0x35   :  { %v1145_v1 = vld [vmem:[%s1475_s0] ss:$8 sps:$4 sm:$0xff]   ;;  %v1150_v3 = vld [vmem:[%s1475_s0 + $0x10] ss:$8 sps:$4 sm:$0xff]   ;;  %v1154_v6 = vld [vmem:[%s1475_s0 + $0x34] ss:$8 sps:$4 sm:$0xff]  }
  0x36   :  { %v1153_v5 = vld [vmem:[%s1475_s0 + $0x20] ss:$8 sps:$4 sm:$0xff]   ;;  %v1156_v7 = vld [vmem:[%s1475_s0 + $0x30] ss:$8 sps:$4 sm:$0xff]   ;;  %v763_v9 = vshrl.u32 %v762_v8, 7  ;;  %s1181_s0 = smov [#allocation3]  }
  0x37   :  { %542 = vmatpush1.bf16.msra.mxu0 %v1131_v55  ;;  %615 = vmatpush1.bf16.msra.mxu1 %v1132_v56  ;;  %v760_v12 = vld [vmem:[%s1477_s2] sm:$0xf]  ;;  %s931_s2 = sshll.u32 %s1181_s0, 4  ;;  %s932_s2 = int_to_ptr.vmem [resolvable:$true] %s931_s2 }
  0x38   :  { %543 = vmatprep.subr.bf16.mxu0 %v1133_v57  ;;  %616 = vmatprep.subr.bf16.mxu1 %v1135_v58  ;;  %v764_v10 = vsub.s32 0, %v763_v9  ;;  %v772_v11 = vsub.s32 2, %v763_v9  ;;  %v768_v13 = vsub.s32 1, %v763_v9  ;;  %v776_v14 = vsub.s32 3, %v763_v9  ;;  %s1157_s22 = scalar_lea.vmem %s932_s2, 2048  ;;  %p1162_p1 = scmp.lt.s32.totalorder %s932_s2, %s932_s2 }
  0x39   :  { %p1158_p0 = scmp.ne.s32.totalorder %s932_s2, %s1157_s22  ;;  %p1163_p2 = scmp.lt.s32.totalorder %s1157_s22, %s1157_s22 }
  0x3a   :  { %v1423_v15 = vrot.slane %v760_v12, %v764_v10  ;;  %v1425_v16 = vrot.slane %v760_v12, %v772_v11  ;;  %v1427_v17 = vrot.slane %v760_v12, %v768_v13  ;;  %v1429_v18 = vrot.slane %v760_v12, %v776_v14 }
  0x3b   :  { %544 = vmatpush1.bf16.msra.mxu0 %v1137_v59  ;;  %617 = vmatpush1.bf16.msra.mxu1 %v1138_v60  ;;  %p1164_p3 = por %p1163_p2, %p1162_p1 }
  0x3c   :  { %545 = vmatprep.subr.bf16.mxu0 %v1139_v61  ;;  %618 = vmatprep.subr.bf16.mxu1 %v1141_v62 }
  0x3d   :  { %p1165_p4 = pnand %p1164_p3, %p1158_p0 }
  0x3f   :  { %546 = vmatpush1.bf16.msra.mxu0 %v1143_v63  ;;  %619 = vmatpush1.bf16.msra.mxu1 %v1144_v0 }
  0x42   :  { %548 = vmatmul.mubr.bf16.vlgmr.msra.gmra.mrb[0].mxu0 %v1145_v1  ;;  %621 = vmatmul.mubr.bf16.vlgmr.msra.gmra.mrb[0].mxu1 %v1145_v1 }
  0x43   :  { %557 = vmatprep.mubr.bf16.mxu0 %v1148_v2  ;;  %630 = vmatprep.mubr.bf16.mxu1 %v1148_v2 }
  0x4a   :  { %558 = vmatmul.mubr.bf16.gmra.mrb[4].mxu0 %v1150_v3  ;;  %631 = vmatmul.mubr.bf16.gmra.mrb[4].mxu1 %v1150_v3 }
  0x4b   :  { %567 = vmatprep.mubr.bf16.mxu0 %v1151_v4  ;;  %640 = vmatprep.mubr.bf16.mxu1 %v1151_v4 }
  0x52   :  { %568 = vmatmul.mubr.bf16.gmra.mrb[8].mxu0 %v1153_v5  ;;  %641 = vmatmul.mubr.bf16.gmra.mrb[8].mxu1 %v1153_v5 }
  0x53   :  { %577 = vmatprep.mubr.bf16.mxu0 %v1154_v6  ;;  %650 = vmatprep.mubr.bf16.mxu1 %v1154_v6 }
  0x5a   :  { %578 = vmatmul.mubr.bf16.gmra.mrb[12].mxu0 %v1156_v7  ;;  %651 = vmatmul.mubr.bf16.gmra.mrb[12].mxu1 %v1156_v7 }
 0x115   :  { %v549_v19 = vpop.f32.mrb[0].mxu0  ;;  %v622_v20 = vpop.f32.mrb[0].mxu1 }
 0x116   :  { %v782_v21 = vadd.f32 %v1423_v15, %v549_v19  ;;  %v784_v22 = vadd.f32 %v1425_v16, %v622_v20  ;;  %v551_v23 = vpop.f32.mrb[1].mxu0  ;;  %v624_v24 = vpop.f32.mrb[1].mxu1 }
 0x117   :  { %v783_v25 = vadd.f32 %v1427_v17, %v551_v23  ;;  %v785_v26 = vadd.f32 %v1429_v18, %v624_v24  ;;  %v553_v27 = vpop.f32.mrb[2].mxu0  ;;  %v626_v28 = vpop.f32.mrb[2].mxu1 }
 0x118   :  { %v786_v29 = vadd.f32 %v1423_v15, %v553_v27  ;;  %v788_v30 = vadd.f32 %v1425_v16, %v626_v28  ;;  %v555_v31 = vpop.f32.mrb[3].mxu0  ;;  %v628_v32 = vpop.f32.mrb[3].mxu1 }
 0x119   :  { %v1030_v33 = vpack.c.bf16 %v783_v25, %v782_v21  ;;  %v1031_v34 = vpack.c.bf16 %v785_v26, %v784_v22  ;;  %v787_v35 = vadd.f32 %v1427_v17, %v555_v31  ;;  %v789_v36 = vadd.f32 %v1429_v18, %v628_v32 }
 0x11b   :  { %910 = vst [vmem:[#allocation3] sm:$0xff] %v1030_v33  ;;  %911 = vst [vmem:[#allocation3 + $0x8] sm:$0xff] %v1031_v34  ;;  %v1032_v37 = vpack.c.bf16 %v787_v35, %v786_v29  ;;  %v1033_v38 = vpack.c.bf16 %v789_v36, %v788_v30 }
 0x11d   :  { %912 = vst [vmem:[#allocation3 + $0x10] sm:$0xff] %v1032_v37  ;;  %913 = vst [vmem:[#allocation3 + $0x18] sm:$0xff] %v1033_v38  ;;  %v559_v39 = vpop.f32.mrb[4].mxu0  ;;  %v632_v40 = vpop.f32.mrb[4].mxu1 }
 0x11e   :  { %v790_v41 = vadd.f32 %v1423_v15, %v559_v39  ;;  %v792_v42 = vadd.f32 %v1425_v16, %v632_v40  ;;  %v561_v43 = vpop.f32.mrb[5].mxu0  ;;  %v634_v44 = vpop.f32.mrb[5].mxu1 }
 0x11f   :  { %v791_v45 = vadd.f32 %v1427_v17, %v561_v43  ;;  %v793_v46 = vadd.f32 %v1429_v18, %v634_v44  ;;  %v563_v47 = vpop.f32.mrb[6].mxu0  ;;  %v636_v48 = vpop.f32.mrb[6].mxu1 }
 0x120   :  { %v794_v49 = vadd.f32 %v1423_v15, %v563_v47  ;;  %v796_v50 = vadd.f32 %v1425_v16, %v636_v48  ;;  %v565_v51 = vpop.f32.mrb[7].mxu0  ;;  %v638_v52 = vpop.f32.mrb[7].mxu1 }
 0x121   :  { %v1034_v53 = vpack.c.bf16 %v791_v45, %v790_v41  ;;  %v1035_v54 = vpack.c.bf16 %v793_v46, %v792_v42  ;;  %v795_v55 = vadd.f32 %v1427_v17, %v565_v51  ;;  %v797_v56 = vadd.f32 %v1429_v18, %v638_v52 }
 0x123   :  { %914 = vst [vmem:[#allocation3 + $0x20] sm:$0xff] %v1034_v53  ;;  %915 = vst [vmem:[#allocation3 + $0x28] sm:$0xff] %v1035_v54  ;;  %v1036_v57 = vpack.c.bf16 %v795_v55, %v794_v49  ;;  %v1037_v58 = vpack.c.bf16 %v797_v56, %v796_v50 }
 0x125   :  { %916 = vst [vmem:[#allocation3 + $0x30] sm:$0xff] %v1036_v57  ;;  %917 = vst [vmem:[#allocation3 + $0x38] sm:$0xff] %v1037_v58  ;;  %v569_v59 = vpop.f32.mrb[8].mxu0  ;;  %v642_v60 = vpop.f32.mrb[8].mxu1 }
 0x126   :  { %v798_v61 = vadd.f32 %v1423_v15, %v569_v59  ;;  %v800_v62 = vadd.f32 %v1425_v16, %v642_v60  ;;  %v571_v63 = vpop.f32.mrb[9].mxu0  ;;  %v644_v0 = vpop.f32.mrb[9].mxu1 }
 0x127   :  { %v799_v1 = vadd.f32 %v1427_v17, %v571_v63  ;;  %v801_v2 = vadd.f32 %v1429_v18, %v644_v0  ;;  %v573_v3 = vpop.f32.mrb[10].mxu0  ;;  %v646_v4 = vpop.f32.mrb[10].mxu1 }
 0x128   :  { %v802_v5 = vadd.f32 %v1423_v15, %v573_v3  ;;  %v804_v6 = vadd.f32 %v1425_v16, %v646_v4  ;;  %v575_v7 = vpop.f32.mrb[11].mxu0  ;;  %v648_v8 = vpop.f32.mrb[11].mxu1 }
 0x129   :  { %v1038_v9 = vpack.c.bf16 %v799_v1, %v798_v61  ;;  %v1039_v10 = vpack.c.bf16 %v801_v2, %v800_v62  ;;  %v803_v11 = vadd.f32 %v1427_v17, %v575_v7  ;;  %v805_v12 = vadd.f32 %v1429_v18, %v648_v8 }
 0x12b   :  { %918 = vst [vmem:[#allocation3 + $0x40] sm:$0xff] %v1038_v9  ;;  %919 = vst [vmem:[#allocation3 + $0x48] sm:$0xff] %v1039_v10  ;;  %v1040_v13 = vpack.c.bf16 %v803_v11, %v802_v5  ;;  %v1041_v14 = vpack.c.bf16 %v805_v12, %v804_v6 }
 0x12d   :  { %920 = vst [vmem:[#allocation3 + $0x50] sm:$0xff] %v1040_v13  ;;  %921 = vst [vmem:[#allocation3 + $0x58] sm:$0xff] %v1041_v14  ;;  %v579_v19 = vpop.f32.mrb[12].mxu0  ;;  %v652_v20 = vpop.f32.mrb[12].mxu1 }
 0x12e   :  { %v806_v21 = vadd.f32 %v1423_v15, %v579_v19  ;;  %v808_v22 = vadd.f32 %v1425_v16, %v652_v20  ;;  %v581_v23 = vpop.f32.mrb[13].mxu0  ;;  %v654_v24 = vpop.f32.mrb[13].mxu1 }
 0x12f   :  { %v807_v25 = vadd.f32 %v1427_v17, %v581_v23  ;;  %v809_v26 = vadd.f32 %v1429_v18, %v654_v24  ;;  %v583_v27 = vpop.f32.mrb[14].mxu0  ;;  %v656_v28 = vpop.f32.mrb[14].mxu1 }
 0x130   :  { %v810_v29 = vadd.f32 %v1423_v15, %v583_v27  ;;  %v812_v30 = vadd.f32 %v1425_v16, %v656_v28  ;;  %v585_v31 = vpop.f32.mrb[15].mxu0  ;;  %v658_v32 = vpop.f32.mrb[15].mxu1 }
 0x131   :  { %v1042_v33 = vpack.c.bf16 %v807_v25, %v806_v21  ;;  %v1043_v34 = vpack.c.bf16 %v809_v26, %v808_v22  ;;  %v811_v35 = vadd.f32 %v1427_v17, %v585_v31  ;;  %v813_v36 = vadd.f32 %v1429_v18, %v658_v32 }
 0x133   :  { %922 = vst [vmem:[#allocation3 + $0x60] sm:$0xff] %v1042_v33  ;;  %923 = vst [vmem:[#allocation3 + $0x68] sm:$0xff] %v1043_v34  ;;  %v1044_v37 = vpack.c.bf16 %v811_v35, %v810_v29  ;;  %v1045_v38 = vpack.c.bf16 %v813_v36, %v812_v30 }
 0x135   :  { %924 = vst [vmem:[#allocation3 + $0x70] sm:$0xff] %v1044_v37  ;;  %925 = vst [vmem:[#allocation3 + $0x78] sm:$0xff] %v1045_v38 }
 0x136   :  { %1168 = shalt.err (!%p1165_p4)
}
 0x137   :  { %s1169_s25 = scalar_lea.hbm %s1478_s3, 2048 }
 0x138   :  { %p1170_p5 = scmp.ne.s32.totalorder %s1478_s3, %s1169_s25  ;;  %p1173_p6 = scmp.lt.u32.totalorder %s1169_s25, %s1478_s3 }
 0x13a   :  { %p1175_p7 = pnand %p1173_p6, %p1170_p5 }
 0x13c   :  { %1178 = shalt.err (!%p1175_p7)
}
 0x13d   :  { %s1182_s30 = smov 256   ;;  %s1183_s4 = smov 16  }
 0x13e   :  { %937 = dma.vmem_to_hbm [thread:$0]  %s932_s2, 2048, %s1478_s3, [#allocation4], %s1182_s30, %s1182_s30, %s1183_s4  }
 0x13f   :  { %1179 = dma.done.wait [#allocation4], 2048  }
 0x140   :  { %1180 = vsyncadd [#allocation4], 4294965248 }
 0x141   :  { %941 = vsyncpa [#allocation4], 1 }

// kernel: decoder_rnn_forward.3
= control target key start
LH: loop header
LB: loop body
LE: loop exit
PB: predicated region body
PF: predicated region fallthrough
CT: control target
= control target key end

     0   :  { %s2650_s1 = inlined_call_operand.vmem [shape: bf16[256,1024], index: 1, kind: input, shape index: {}]   ;;  %s2651_s0 = inlined_call_operand.vmem [shape: bf16[64,256], index: 0, kind: input, shape index: {}]   ;;  %s2652_s2 = inlined_call_operand.vmem [shape: f32[1,1024], index: 2, kind: input, shape index: {}]   ;;  %s2653_s3 = inlined_call_operand.vmem [shape: bf16[64,1024], index: 3, kind: output, shape index: {}]  }
   0x1   :  { %v154_v0 = vld [vmem:[%s2650_s1] sm:$0xff]  ;;  %v155_v2 = vld [vmem:[%s2650_s1 + $0x8] sm:$0xff] }
   0x2   :  { %v158_v1 = vld [vmem:[%s2650_s1 + $0x20] sm:$0xff]  ;;  %v159_v4 = vld [vmem:[%s2650_s1 + $0x28] sm:$0xff] }
   0x3   :  { %v1792_v3 = vcombine.high %v154_v0, %v158_v1  ;;  %v1791_v5 = vcombine.low %v154_v0, %v158_v1  ;;  %v162_v6 = vld [vmem:[%s2650_s1 + $0x40] sm:$0xff]  ;;  %v1794_v8 = vcombine.high %v155_v2, %v159_v4  ;;  %v1793_v9 = vcombine.low %v155_v2, %v159_v4  ;;  %v163_v11 = vld [vmem:[%s2650_s1 + $0x48] sm:$0xff] }
   0x4   :  { %v166_v7 = vld [vmem:[%s2650_s1 + $0x60] sm:$0xff]  ;;  %v167_v12 = vld [vmem:[%s2650_s1 + $0x68] sm:$0xff] }
   0x5   :  { %v1800_v10 = vcombine.high %v162_v6, %v166_v7  ;;  %v170_v13 = vld [vmem:[%s2650_s1 + $0x80] sm:$0xff]  ;;  %962 = vmatprep.subr.bf16.mxu0 %v1792_v3  ;;  %v1802_v14 = vcombine.high %v163_v11, %v167_v12  ;;  %v171_v16 = vld [vmem:[%s2650_s1 + $0x88] sm:$0xff]  ;;  %1035 = vmatprep.subr.bf16.mxu1 %v1794_v8  ;;  %v1799_v18 = vcombine.low %v162_v6, %v166_v7 }
   0x6   :  { %v174_v15 = vld [vmem:[%s2650_s1 + $0xa0] sm:$0xff]  ;;  %v175_v17 = vld [vmem:[%s2650_s1 + $0xa8] sm:$0xff]  ;;  %963 = vmatpush1.bf16.msra.mxu0 %v1791_v5  ;;  %1036 = vmatpush1.bf16.msra.mxu1 %v1793_v9  ;;  %v1801_v19 = vcombine.low %v163_v11, %v167_v12 }
   0x7   :  { %964 = vmatprep.subr.bf16.mxu0 %v1800_v10  ;;  %v1808_v20 = vcombine.high %v170_v13, %v174_v15  ;;  %1037 = vmatprep.subr.bf16.mxu1 %v1802_v14  ;;  %v1810_v21 = vcombine.high %v171_v16, %v175_v17  ;;  %v178_v22 = vld [vmem:[%s2650_s1 + $0xc0] sm:$0xff]  ;;  %v179_v24 = vld [vmem:[%s2650_s1 + $0xc8] sm:$0xff]  ;;  %v1807_v26 = vcombine.low %v170_v13, %v174_v15 }
   0x8   :  { %v182_v23 = vld [vmem:[%s2650_s1 + $0xe0] sm:$0xff]  ;;  %v183_v25 = vld [vmem:[%s2650_s1 + $0xe8] sm:$0xff]  ;;  %v1809_v27 = vcombine.low %v171_v16, %v175_v17 }
   0x9   :  { %v1816_v28 = vcombine.high %v178_v22, %v182_v23  ;;  %v1818_v29 = vcombine.high %v179_v24, %v183_v25  ;;  %v186_v30 = vld [vmem:[%s2650_s1 + $0x100] sm:$0xff]  ;;  %v187_v32 = vld [vmem:[%s2650_s1 + $0x108] sm:$0xff]  ;;  %v1815_v34 = vcombine.low %v178_v22, %v182_v23  ;;  %v1817_v35 = vcombine.low %v179_v24, %v183_v25 }
   0xa   :  { %965 = vmatpush1.bf16.msra.mxu0 %v1799_v18  ;;  %1038 = vmatpush1.bf16.msra.mxu1 %v1801_v19  ;;  %v190_v31 = vld [vmem:[%s2650_s1 + $0x120] sm:$0xff]  ;;  %v191_v33 = vld [vmem:[%s2650_s1 + $0x128] sm:$0xff] }
   0xb   :  { %966 = vmatprep.subr.bf16.mxu0 %v1808_v20  ;;  %1039 = vmatprep.subr.bf16.mxu1 %v1810_v21  ;;  %v1824_v36 = vcombine.high %v186_v30, %v190_v31  ;;  %v1826_v37 = vcombine.high %v187_v32, %v191_v33  ;;  %v194_v38 = vld [vmem:[%s2650_s1 + $0x140] sm:$0xff]  ;;  %v195_v40 = vld [vmem:[%s2650_s1 + $0x148] sm:$0xff]  ;;  %v1823_v42 = vcombine.low %v186_v30, %v190_v31 }
   0xc   :  { %v198_v39 = vld [vmem:[%s2650_s1 + $0x160] sm:$0xff]  ;;  %v199_v41 = vld [vmem:[%s2650_s1 + $0x168] sm:$0xff]  ;;  %v1825_v43 = vcombine.low %v187_v32, %v191_v33 }
   0xd   :  { %v1832_v44 = vcombine.high %v194_v38, %v198_v39  ;;  %v1834_v45 = vcombine.high %v195_v40, %v199_v41  ;;  %v202_v46 = vld [vmem:[%s2650_s1 + $0x180] sm:$0xff]  ;;  %v203_v48 = vld [vmem:[%s2650_s1 + $0x188] sm:$0xff]  ;;  %v1831_v50 = vcombine.low %v194_v38, %v198_v39  ;;  %v1833_v51 = vcombine.low %v195_v40, %v199_v41 }
   0xe   :  { %967 = vmatpush1.bf16.msra.mxu0 %v1807_v26  ;;  %1040 = vmatpush1.bf16.msra.mxu1 %v1809_v27  ;;  %v206_v47 = vld [vmem:[%s2650_s1 + $0x1a0] sm:$0xff]  ;;  %v207_v49 = vld [vmem:[%s2650_s1 + $0x1a8] sm:$0xff] }
   0xf   :  { %968 = vmatprep.subr.bf16.mxu0 %v1816_v28  ;;  %1041 = vmatprep.subr.bf16.mxu1 %v1818_v29  ;;  %v1840_v52 = vcombine.high %v202_v46, %v206_v47  ;;  %v1842_v53 = vcombine.high %v203_v48, %v207_v49  ;;  %v210_v54 = vld [vmem:[%s2650_s1 + $0x1c0] sm:$0xff]  ;;  %v211_v57 = vld [vmem:[%s2650_s1 + $0x1c8] sm:$0xff]  ;;  %v1839_v59 = vcombine.low %v202_v46, %v206_v47 }
  0x10   :  { %v214_v55 = vld [vmem:[%s2650_s1 + $0x1e0] sm:$0xff]  ;;  %v215_v58 = vld [vmem:[%s2650_s1 + $0x1e8] sm:$0xff]  ;;  %v1841_v60 = vcombine.low %v203_v48, %v207_v49 }
  0x11   :  { %v2108_v56 = vld [vmem:[%s2651_s0 + $0x4] ss:$8 sps:$4 sm:$0xff]   ;;  %v1848_v61 = vcombine.high %v210_v54, %v214_v55  ;;  %v1850_v62 = vcombine.high %v211_v57, %v215_v58  ;;  %v1847_v3 = vcombine.low %v210_v54, %v214_v55  ;;  %v1849_v4 = vcombine.low %v211_v57, %v215_v58 }
  0x12   :  { %969 = vmatpush1.bf16.msra.mxu0 %v1815_v34  ;;  %1042 = vmatpush1.bf16.msra.mxu1 %v1817_v35  ;;  %v218_v63 = vld [vmem:[%s2650_s1 + $0x200] sm:$0xff]  ;;  %v219_v1 = vld [vmem:[%s2650_s1 + $0x208] sm:$0xff] }
  0x13   :  { %970 = vmatprep.subr.bf16.mxu0 %v1824_v36  ;;  %1043 = vmatprep.subr.bf16.mxu1 %v1826_v37  ;;  %v222_v0 = vld [vmem:[%s2650_s1 + $0x220] sm:$0xff]  ;;  %v223_v2 = vld [vmem:[%s2650_s1 + $0x228] sm:$0xff] }
  0x14   :  { %994 = vmatprep.mubr.bf16.mxu0 %v2108_v56  ;;  %1067 = vmatprep.mubr.bf16.mxu1 %v2108_v56  ;;  %v1856_v5 = vcombine.high %v218_v63, %v222_v0  ;;  %v1858_v6 = vcombine.high %v219_v1, %v223_v2  ;;  %v226_v7 = vld [vmem:[%s2650_s1 + $0x240] sm:$0xff]  ;;  %v227_v9 = vld [vmem:[%s2650_s1 + $0x248] sm:$0xff]  ;;  %v1855_v11 = vcombine.low %v218_v63, %v222_v0  ;;  %v156_v0 = vld [vmem:[%s2650_s1 + $0x10] sm:$0xff] }
  0x15   :  { %v230_v8 = vld [vmem:[%s2650_s1 + $0x260] sm:$0xff]  ;;  %v231_v10 = vld [vmem:[%s2650_s1 + $0x268] sm:$0xff]  ;;  %v1857_v12 = vcombine.low %v219_v1, %v223_v2  ;;  %v160_v1 = vld [vmem:[%s2650_s1 + $0x30] sm:$0xff] }
  0x16   :  { %971 = vmatpush1.bf16.msra.mxu0 %v1823_v42  ;;  %1044 = vmatpush1.bf16.msra.mxu1 %v1825_v43  ;;  %v1864_v13 = vcombine.high %v226_v7, %v230_v8  ;;  %v1866_v14 = vcombine.high %v227_v9, %v231_v10  ;;  %v234_v15 = vld [vmem:[%s2650_s1 + $0x280] sm:$0xff]  ;;  %v235_v17 = vld [vmem:[%s2650_s1 + $0x288] sm:$0xff]  ;;  %v1863_v19 = vcombine.low %v226_v7, %v230_v8  ;;  %v157_v2 = vld [vmem:[%s2650_s1 + $0x18] sm:$0xff] }
  0x17   :  { %972 = vmatprep.subr.bf16.mxu0 %v1832_v44  ;;  %1045 = vmatprep.subr.bf16.mxu1 %v1834_v45  ;;  %v238_v16 = vld [vmem:[%s2650_s1 + $0x2a0] sm:$0xff]  ;;  %v239_v18 = vld [vmem:[%s2650_s1 + $0x2a8] sm:$0xff]  ;;  %v1865_v20 = vcombine.low %v227_v9, %v231_v10  ;;  %v164_v8 = vld [vmem:[%s2650_s1 + $0x50] sm:$0xff] }
  0x18   :  { %v1872_v21 = vcombine.high %v234_v15, %v238_v16  ;;  %v1874_v22 = vcombine.high %v235_v17, %v239_v18  ;;  %v242_v23 = vld [vmem:[%s2650_s1 + $0x2c0] sm:$0xff]  ;;  %v243_v25 = vld [vmem:[%s2650_s1 + $0x2c8] sm:$0xff]  ;;  %v1871_v27 = vcombine.low %v234_v15, %v238_v16  ;;  %v1873_v28 = vcombine.low %v235_v17, %v239_v18  ;;  %v168_v9 = vld [vmem:[%s2650_s1 + $0x70] sm:$0xff] }
  0x19   :  { %v246_v24 = vld [vmem:[%s2650_s1 + $0x2e0] sm:$0xff]  ;;  %v247_v26 = vld [vmem:[%s2650_s1 + $0x2e8] sm:$0xff]  ;;  %v1804_v15 = vcombine.high %v164_v8, %v168_v9  ;;  %v172_v17 = vld [vmem:[%s2650_s1 + $0x90] sm:$0xff] }
  0x1a   :  { %973 = vmatpush1.bf16.msra.mxu0 %v1831_v50  ;;  %1046 = vmatpush1.bf16.msra.mxu1 %v1833_v51  ;;  %v1880_v29 = vcombine.high %v242_v23, %v246_v24  ;;  %v1882_v30 = vcombine.high %v243_v25, %v247_v26  ;;  %v250_v31 = vld [vmem:[%s2650_s1 + $0x300] sm:$0xff]  ;;  %v251_v33 = vld [vmem:[%s2650_s1 + $0x308] sm:$0xff]  ;;  %v1879_v35 = vcombine.low %v242_v23, %v246_v24  ;;  %v176_v18 = vld [vmem:[%s2650_s1 + $0xb0] sm:$0xff] }
  0x1b   :  { %974 = vmatprep.subr.bf16.mxu0 %v1840_v52  ;;  %1047 = vmatprep.subr.bf16.mxu1 %v1842_v53  ;;  %v254_v32 = vld [vmem:[%s2650_s1 + $0x320] sm:$0xff]  ;;  %v255_v34 = vld [vmem:[%s2650_s1 + $0x328] sm:$0xff]  ;;  %v1881_v36 = vcombine.low %v243_v25, %v247_v26  ;;  %v1812_v24 = vcombine.high %v172_v17, %v176_v18  ;;  %v180_v26 = vld [vmem:[%s2650_s1 + $0xd0] sm:$0xff] }
  0x1c   :  { %v1888_v37 = vcombine.high %v250_v31, %v254_v32  ;;  %v1890_v38 = vcombine.high %v251_v33, %v255_v34  ;;  %v258_v39 = vld [vmem:[%s2650_s1 + $0x340] sm:$0xff]  ;;  %v259_v41 = vld [vmem:[%s2650_s1 + $0x348] sm:$0xff]  ;;  %v1887_v43 = vcombine.low %v250_v31, %v254_v32  ;;  %v1889_v44 = vcombine.low %v251_v33, %v255_v34 }
  0x1d   :  { %v262_v40 = vld [vmem:[%s2650_s1 + $0x360] sm:$0xff]  ;;  %v263_v42 = vld [vmem:[%s2650_s1 + $0x368] sm:$0xff]  ;;  %v1811_v31 = vcombine.low %v172_v17, %v176_v18  ;;  %v228_v17 = vld [vmem:[%s2650_s1 + $0x250] sm:$0xff] }
  0x1e   :  { %975 = vmatpush1.bf16.msra.mxu0 %v1839_v59  ;;  %1048 = vmatpush1.bf16.msra.mxu1 %v1841_v60  ;;  %v1896_v45 = vcombine.high %v258_v39, %v262_v40  ;;  %v1898_v46 = vcombine.high %v259_v41, %v263_v42  ;;  %v266_v47 = vld [vmem:[%s2650_s1 + $0x380] sm:$0xff]  ;;  %v267_v49 = vld [vmem:[%s2650_s1 + $0x388] sm:$0xff]  ;;  %v1895_v51 = vcombine.low %v258_v39, %v262_v40  ;;  %v193_v39 = vld [vmem:[%s2650_s1 + $0x138] sm:$0xff] }
  0x1f   :  { %976 = vmatprep.subr.bf16.mxu0 %v1848_v61  ;;  %1049 = vmatprep.subr.bf16.mxu1 %v1850_v62  ;;  %v270_v48 = vld [vmem:[%s2650_s1 + $0x3a0] sm:$0xff]  ;;  %v271_v50 = vld [vmem:[%s2650_s1 + $0x3a8] sm:$0xff]  ;;  %v1897_v52 = vcombine.low %v259_v41, %v263_v42  ;;  %v232_v18 = vld [vmem:[%s2650_s1 + $0x270] sm:$0xff] }
  0x20   :  { %v1904_v53 = vcombine.high %v266_v47, %v270_v48  ;;  %v1906_v54 = vcombine.high %v267_v49, %v271_v50  ;;  %v274_v55 = vld [vmem:[%s2650_s1 + $0x3c0] sm:$0xff]  ;;  %v275_v58 = vld [vmem:[%s2650_s1 + $0x3c8] sm:$0xff]  ;;  %v1903_v60 = vcombine.low %v266_v47, %v270_v48  ;;  %v1905_v61 = vcombine.low %v267_v49, %v271_v50  ;;  %v201_v47 = vld [vmem:[%s2650_s1 + $0x178] sm:$0xff] }
  0x21   :  { %v278_v57 = vld [vmem:[%s2650_s1 + $0x3e0] sm:$0xff]  ;;  %v279_v59 = vld [vmem:[%s2650_s1 + $0x3e8] sm:$0xff] }
  0x22   :  { %977 = vmatpush1.bf16.msra.mxu0 %v1847_v3  ;;  %1050 = vmatpush1.bf16.msra.mxu1 %v1849_v4  ;;  %v1912_v62 = vcombine.high %v274_v55, %v278_v57  ;;  %v1914_v63 = vcombine.high %v275_v58, %v279_v59  ;;  %v161_v3 = vld [vmem:[%s2650_s1 + $0x38] sm:$0xff]  ;;  %v1911_v4 = vcombine.low %v274_v55, %v278_v57  ;;  %v2235_v10 = vld [vmem:[%s2651_s0] ss:$8 sps:$4 sm:$0xff]  }
  0x23   :  { %978 = vmatprep.subr.bf16.mxu0 %v1856_v5  ;;  %1051 = vmatprep.subr.bf16.mxu1 %v1858_v6  ;;  %v1913_v5 = vcombine.low %v275_v58, %v279_v59  ;;  %v1796_v6 = vcombine.high %v156_v0, %v160_v1  ;;  %v1798_v7 = vcombine.high %v157_v2, %v161_v3  ;;  %v2317_v48 = vld [vmem:[%s2651_s0 + $0x20] ss:$8 sps:$4 sm:$0xff]   ;;  %v2328_v55 = vld [vmem:[%s2651_s0 + $0x34] ss:$8 sps:$4 sm:$0xff]  }
  0x24   :  { %v205_v57 = vld [vmem:[%s2650_s1 + $0x198] sm:$0xff] }
  0x25   :  { %v209_v58 = vld [vmem:[%s2650_s1 + $0x1b8] sm:$0xff] }
  0x26   :  { %979 = vmatpush1.bf16.msra.mxu0 %v1855_v11  ;;  %1052 = vmatpush1.bf16.msra.mxu1 %v1857_v12  ;;  %v165_v11 = vld [vmem:[%s2650_s1 + $0x58] sm:$0xff] }
  0x27   :  { %980 = vmatprep.subr.bf16.mxu0 %v1864_v13  ;;  %1053 = vmatprep.subr.bf16.mxu1 %v1866_v14  ;;  %v169_v12 = vld [vmem:[%s2650_s1 + $0x78] sm:$0xff]  ;;  %v1795_v13 = vcombine.low %v156_v0, %v160_v1  ;;  %v1797_v14 = vcombine.low %v157_v2, %v161_v3  ;;  %v216_v0 = vld [vmem:[%s2650_s1 + $0x1f0] sm:$0xff] }
  0x28   :  { %v1806_v16 = vcombine.high %v165_v11, %v169_v12  ;;  %v1805_v23 = vcombine.low %v165_v11, %v169_v12  ;;  %v213_v1 = vld [vmem:[%s2650_s1 + $0x1d8] sm:$0xff] }
  0x29   :  { %v217_v2 = vld [vmem:[%s2650_s1 + $0x1f8] sm:$0xff] }
  0x2a   :  { %981 = vmatpush1.bf16.msra.mxu0 %v1863_v19  ;;  %1054 = vmatpush1.bf16.msra.mxu1 %v1865_v20  ;;  %v2252_v19 = vld [vmem:[%s2651_s0 + $0x14] ss:$8 sps:$4 sm:$0xff]   ;;  %v2355_v3 = vld [vmem:[%s2651_s0 + $0x30] ss:$8 sps:$4 sm:$0xff]  }
  0x2b   :  { %982 = vmatprep.subr.bf16.mxu0 %v1872_v21  ;;  %1055 = vmatprep.subr.bf16.mxu1 %v1874_v22  ;;  %v173_v20 = vld [vmem:[%s2650_s1 + $0x98] sm:$0xff]  ;;  %v1803_v22 = vcombine.low %v164_v8, %v168_v9  ;;  %v220_v8 = vld [vmem:[%s2650_s1 + $0x210] sm:$0xff] }
  0x2c   :  { %v177_v21 = vld [vmem:[%s2650_s1 + $0xb8] sm:$0xff]  ;;  %v224_v9 = vld [vmem:[%s2650_s1 + $0x230] sm:$0xff] }
  0x2d   :  { %v1814_v25 = vcombine.high %v173_v20, %v177_v21  ;;  %v1813_v32 = vcombine.low %v173_v20, %v177_v21  ;;  %v221_v11 = vld [vmem:[%s2650_s1 + $0x218] sm:$0xff] }
  0x2e   :  { %983 = vmatpush1.bf16.msra.mxu0 %v1871_v27  ;;  %1056 = vmatpush1.bf16.msra.mxu1 %v1873_v28  ;;  %v184_v27 = vld [vmem:[%s2650_s1 + $0xf0] sm:$0xff]  ;;  %v181_v28 = vld [vmem:[%s2650_s1 + $0xd8] sm:$0xff] }
  0x2f   :  { %984 = vmatprep.subr.bf16.mxu0 %v1880_v29  ;;  %1057 = vmatprep.subr.bf16.mxu1 %v1882_v30  ;;  %v185_v29 = vld [vmem:[%s2650_s1 + $0xf8] sm:$0xff]  ;;  %v1820_v33 = vcombine.high %v180_v26, %v184_v27  ;;  %v1819_v40 = vcombine.low %v180_v26, %v184_v27  ;;  %v236_v26 = vld [vmem:[%s2650_s1 + $0x290] sm:$0xff] }
  0x30   :  { %v2279_v30 = vld [vmem:[%s2651_s0 + $0x10] ss:$8 sps:$4 sm:$0xff]   ;;  %v1822_v34 = vcombine.high %v181_v28, %v185_v29  ;;  %v1821_v41 = vcombine.low %v181_v28, %v185_v29  ;;  %v1867_v29 = vcombine.low %v228_v17, %v232_v18 }
  0x31   :  { %v225_v12 = vld [vmem:[%s2650_s1 + $0x238] sm:$0xff]  ;;  %v240_v27 = vld [vmem:[%s2650_s1 + $0x2b0] sm:$0xff] }
  0x32   :  { %985 = vmatpush1.bf16.msra.mxu0 %v1879_v35  ;;  %1058 = vmatpush1.bf16.msra.mxu1 %v1881_v36  ;;  %v188_v35 = vld [vmem:[%s2650_s1 + $0x110] sm:$0xff]  ;;  %v229_v20 = vld [vmem:[%s2650_s1 + $0x258] sm:$0xff] }
  0x33   :  { %986 = vmatprep.subr.bf16.mxu0 %v1888_v37  ;;  %1059 = vmatprep.subr.bf16.mxu1 %v1890_v38  ;;  %v192_v36 = vld [vmem:[%s2650_s1 + $0x130] sm:$0xff]  ;;  %v2290_v37 = vld [vmem:[%s2651_s0 + $0x24] ss:$8 sps:$4 sm:$0xff]   ;;  %v189_v38 = vld [vmem:[%s2650_s1 + $0x118] sm:$0xff] }
  0x34   :  { %v1828_v42 = vcombine.high %v188_v35, %v192_v36  ;;  %v1827_v49 = vcombine.low %v188_v35, %v192_v36  ;;  %v1829_v50 = vcombine.low %v189_v38, %v193_v39  ;;  %v233_v21 = vld [vmem:[%s2650_s1 + $0x278] sm:$0xff]  ;;  %v248_v35 = vld [vmem:[%s2650_s1 + $0x2f0] sm:$0xff] }
  0x35   :  { %v241_v28 = vld [vmem:[%s2650_s1 + $0x2b8] sm:$0xff] }
  0x36   :  { %987 = vmatpush1.bf16.msra.mxu0 %v1887_v43  ;;  %1060 = vmatpush1.bf16.msra.mxu1 %v1889_v44  ;;  %v1830_v43 = vcombine.high %v189_v38, %v193_v39  ;;  %v196_v44 = vld [vmem:[%s2650_s1 + $0x150] sm:$0xff]  ;;  %v245_v36 = vld [vmem:[%s2650_s1 + $0x2d8] sm:$0xff]  ;;  %v1875_v39 = vcombine.low %v236_v26, %v240_v27 }
  0x37   :  { %988 = vmatprep.subr.bf16.mxu0 %v1896_v45  ;;  %1061 = vmatprep.subr.bf16.mxu1 %v1898_v46  ;;  %v200_v45 = vld [vmem:[%s2650_s1 + $0x170] sm:$0xff]  ;;  %v197_v46 = vld [vmem:[%s2650_s1 + $0x158] sm:$0xff] }
  0x38   :  { %v1835_v59 = vcombine.low %v196_v44, %v200_v45  ;;  %v249_v38 = vld [vmem:[%s2650_s1 + $0x2f8] sm:$0xff] }
  0x3a   :  { %989 = vmatpush1.bf16.msra.mxu0 %v1895_v51  ;;  %1062 = vmatpush1.bf16.msra.mxu1 %v1897_v52  ;;  %v1836_v51 = vcombine.high %v196_v44, %v200_v45  ;;  %v1838_v52 = vcombine.high %v197_v46, %v201_v47  ;;  %v256_v44 = vld [vmem:[%s2650_s1 + $0x330] sm:$0xff]  ;;  %v253_v45 = vld [vmem:[%s2650_s1 + $0x318] sm:$0xff] }
  0x3b   :  { %990 = vmatprep.subr.bf16.mxu0 %v1904_v53  ;;  %1063 = vmatprep.subr.bf16.mxu1 %v1906_v54  ;;  %v204_v53 = vld [vmem:[%s2650_s1 + $0x190] sm:$0xff] }
  0x3c   :  { %v208_v54 = vld [vmem:[%s2650_s1 + $0x1b0] sm:$0xff] }
  0x3e   :  { %991 = vmatpush1.bf16.msra.mxu0 %v1903_v60  ;;  %1064 = vmatpush1.bf16.msra.mxu1 %v1905_v61  ;;  %v1837_v60 = vcombine.low %v197_v46, %v201_v47  ;;  %v1844_v61 = vcombine.high %v204_v53, %v208_v54  ;;  %v257_v46 = vld [vmem:[%s2650_s1 + $0x338] sm:$0xff] }
  0x3f   :  { %992 = vmatprep.subr.bf16.mxu0 %v1912_v62  ;;  %1065 = vmatprep.subr.bf16.mxu1 %v1914_v63  ;;  %v1846_v62 = vcombine.high %v205_v57, %v209_v58  ;;  %v212_v63 = vld [vmem:[%s2650_s1 + $0x1d0] sm:$0xff] }
  0x42   :  { %993 = vmatpush1.bf16.msra.mxu0 %v1911_v4  ;;  %1066 = vmatpush1.bf16.msra.mxu1 %v1913_v5  ;;  %v1843_v4 = vcombine.low %v204_v53, %v208_v54  ;;  %v1845_v5 = vcombine.low %v205_v57, %v209_v58  ;;  %v264_v53 = vld [vmem:[%s2650_s1 + $0x370] sm:$0xff]  ;;  %v261_v54 = vld [vmem:[%s2650_s1 + $0x358] sm:$0xff] }
  0x43   :  { %1108 = vmatprep.subr.bf16.mxu0 %v1796_v6  ;;  %1181 = vmatprep.subr.bf16.mxu1 %v1798_v7  ;;  %v1852_v6 = vcombine.high %v212_v63, %v216_v0  ;;  %v1854_v7 = vcombine.high %v213_v1, %v217_v2  ;;  %v265_v57 = vld [vmem:[%s2650_s1 + $0x378] sm:$0xff] }
  0x45   :  { %995 = vmatmul.mubr.bf16.vlgmr.msra.gmra.mrb[0].mxu0 %v2235_v10  ;;  %1068 = vmatmul.mubr.bf16.vlgmr.msra.gmra.mrb[0].mxu1 %v2235_v10 }
  0x46   :  { %1109 = vmatpush1.bf16.msra.mxu0 %v1795_v13  ;;  %1182 = vmatpush1.bf16.msra.mxu1 %v1797_v14  ;;  %v1851_v13 = vcombine.low %v212_v63, %v216_v0  ;;  %v1853_v14 = vcombine.low %v213_v1, %v217_v2  ;;  %v272_v63 = vld [vmem:[%s2650_s1 + $0x3b0] sm:$0xff]  ;;  %v269_v0 = vld [vmem:[%s2650_s1 + $0x398] sm:$0xff] }
  0x47   :  { %1110 = vmatprep.subr.bf16.mxu0 %v1804_v15  ;;  %1183 = vmatprep.subr.bf16.mxu1 %v1806_v16  ;;  %v1860_v15 = vcombine.high %v220_v8, %v224_v9  ;;  %v1862_v16 = vcombine.high %v221_v11, %v225_v12  ;;  %v273_v1 = vld [vmem:[%s2650_s1 + $0x3b8] sm:$0xff] }
  0x48   :  { %1004 = vmatprep.mubr.bf16.mxu0 %v2252_v19  ;;  %1077 = vmatprep.mubr.bf16.mxu1 %v2252_v19 }
  0x4a   :  { %1111 = vmatpush1.bf16.msra.mxu0 %v1803_v22  ;;  %1184 = vmatpush1.bf16.msra.mxu1 %v1805_v23  ;;  %v1859_v22 = vcombine.low %v220_v8, %v224_v9  ;;  %v1861_v23 = vcombine.low %v221_v11, %v225_v12  ;;  %v280_v8 = vld [vmem:[%s2650_s1 + $0x3f0] sm:$0xff]  ;;  %v277_v9 = vld [vmem:[%s2650_s1 + $0x3d8] sm:$0xff] }
  0x4b   :  { %1112 = vmatprep.subr.bf16.mxu0 %v1812_v24  ;;  %1185 = vmatprep.subr.bf16.mxu1 %v1814_v25  ;;  %v1868_v24 = vcombine.high %v228_v17, %v232_v18  ;;  %v1870_v25 = vcombine.high %v229_v20, %v233_v21  ;;  %v281_v11 = vld [vmem:[%s2650_s1 + $0x3f8] sm:$0xff] }
  0x4c   :  { %v1917_v17 = vcombine.low %v277_v9, %v281_v11 }
  0x4d   :  { %1005 = vmatmul.mubr.bf16.gmra.mrb[4].mxu0 %v2279_v30  ;;  %1078 = vmatmul.mubr.bf16.gmra.mrb[4].mxu1 %v2279_v30 }
  0x4e   :  { %1113 = vmatpush1.bf16.msra.mxu0 %v1811_v31  ;;  %1186 = vmatpush1.bf16.msra.mxu1 %v1813_v32  ;;  %v1869_v31 = vcombine.low %v229_v20, %v233_v21  ;;  %v1876_v32 = vcombine.high %v236_v26, %v240_v27 }
  0x4f   :  { %1114 = vmatprep.subr.bf16.mxu0 %v1820_v33  ;;  %1187 = vmatprep.subr.bf16.mxu1 %v1822_v34  ;;  %v244_v34 = vld [vmem:[%s2650_s1 + $0x2d0] sm:$0xff] }
  0x50   :  { %1014 = vmatprep.mubr.bf16.mxu0 %v2290_v37  ;;  %1087 = vmatprep.mubr.bf16.mxu1 %v2290_v37  ;;  %v1883_v47 = vcombine.low %v244_v34, %v248_v35 }
  0x52   :  { %1115 = vmatpush1.bf16.msra.mxu0 %v1819_v40  ;;  %1188 = vmatpush1.bf16.msra.mxu1 %v1821_v41  ;;  %v1884_v41 = vcombine.high %v244_v34, %v248_v35 }
  0x53   :  { %1116 = vmatprep.subr.bf16.mxu0 %v1828_v42  ;;  %1189 = vmatprep.subr.bf16.mxu1 %v1830_v43  ;;  %v1886_v42 = vcombine.high %v245_v36, %v249_v38  ;;  %v252_v43 = vld [vmem:[%s2650_s1 + $0x310] sm:$0xff] }
  0x54   :  { %v1891_v58 = vcombine.low %v252_v43, %v256_v44 }
  0x55   :  { %1015 = vmatmul.mubr.bf16.gmra.mrb[8].mxu0 %v2317_v48  ;;  %1088 = vmatmul.mubr.bf16.gmra.mrb[8].mxu1 %v2317_v48 }
  0x56   :  { %1117 = vmatpush1.bf16.msra.mxu0 %v1827_v49  ;;  %1190 = vmatpush1.bf16.msra.mxu1 %v1829_v50  ;;  %v1885_v49 = vcombine.low %v245_v36, %v249_v38  ;;  %v1892_v50 = vcombine.high %v252_v43, %v256_v44 }
  0x57   :  { %1118 = vmatprep.subr.bf16.mxu0 %v1836_v51  ;;  %1191 = vmatprep.subr.bf16.mxu1 %v1838_v52  ;;  %v1894_v51 = vcombine.high %v253_v45, %v257_v46  ;;  %v260_v52 = vld [vmem:[%s2650_s1 + $0x350] sm:$0xff] }
  0x58   :  { %1024 = vmatprep.mubr.bf16.mxu0 %v2328_v55  ;;  %1097 = vmatprep.mubr.bf16.mxu1 %v2328_v55  ;;  %v1899_v2 = vcombine.low %v260_v52, %v264_v53 }
  0x5a   :  { %1119 = vmatpush1.bf16.msra.mxu0 %v1835_v59  ;;  %1192 = vmatpush1.bf16.msra.mxu1 %v1837_v60  ;;  %v1893_v59 = vcombine.low %v253_v45, %v257_v46  ;;  %v1900_v60 = vcombine.high %v260_v52, %v264_v53 }
  0x5b   :  { %1120 = vmatprep.subr.bf16.mxu0 %v1844_v61  ;;  %1193 = vmatprep.subr.bf16.mxu1 %v1846_v62  ;;  %v1902_v61 = vcombine.high %v261_v54, %v265_v57  ;;  %v268_v62 = vld [vmem:[%s2650_s1 + $0x390] sm:$0xff] }
  0x5c   :  { %v1907_v12 = vcombine.low %v268_v62, %v272_v63 }
  0x5d   :  { %1025 = vmatmul.mubr.bf16.gmra.mrb[12].mxu0 %v2355_v3  ;;  %1098 = vmatmul.mubr.bf16.gmra.mrb[12].mxu1 %v2355_v3 }
  0x5e   :  { %1121 = vmatpush1.bf16.msra.mxu0 %v1843_v4  ;;  %1194 = vmatpush1.bf16.msra.mxu1 %v1845_v5  ;;  %v1901_v4 = vcombine.low %v261_v54, %v265_v57  ;;  %v1908_v5 = vcombine.high %v268_v62, %v272_v63 }
  0x5f   :  { %1122 = vmatprep.subr.bf16.mxu0 %v1852_v6  ;;  %1195 = vmatprep.subr.bf16.mxu1 %v1854_v7  ;;  %v1910_v6 = vcombine.high %v269_v0, %v273_v1  ;;  %v276_v7 = vld [vmem:[%s2650_s1 + $0x3d0] sm:$0xff] }
  0x60   :  { %1140 = vmatprep.mubr.bf16.mxu0 %v2108_v56  ;;  %1213 = vmatprep.mubr.bf16.mxu1 %v2108_v56  ;;  %v237_v56 = vld [vmem:[%s2650_s1 + $0x298] sm:$0xff] }
  0x61   :  { %v1878_v33 = vcombine.high %v237_v56, %v241_v28  ;;  %v1877_v40 = vcombine.low %v237_v56, %v241_v28 }
  0x62   :  { %1123 = vmatpush1.bf16.msra.mxu0 %v1851_v13  ;;  %1196 = vmatpush1.bf16.msra.mxu1 %v1853_v14  ;;  %v1909_v13 = vcombine.low %v269_v0, %v273_v1  ;;  %v1916_v14 = vcombine.high %v276_v7, %v280_v8 }
  0x63   :  { %1124 = vmatprep.subr.bf16.mxu0 %v1860_v15  ;;  %1197 = vmatprep.subr.bf16.mxu1 %v1862_v16  ;;  %v1918_v15 = vcombine.high %v277_v9, %v281_v11  ;;  %v1915_v16 = vcombine.low %v276_v7, %v280_v8 }
  0x66   :  { %1125 = vmatpush1.bf16.msra.mxu0 %v1859_v22  ;;  %1198 = vmatpush1.bf16.msra.mxu1 %v1861_v23 }
  0x67   :  { %1126 = vmatprep.subr.bf16.mxu0 %v1868_v24  ;;  %1199 = vmatprep.subr.bf16.mxu1 %v1870_v25 }
  0x6a   :  { %1127 = vmatpush1.bf16.msra.mxu0 %v1867_v29  ;;  %1200 = vmatpush1.bf16.msra.mxu1 %v1869_v31 }
  0x6b   :  { %1128 = vmatprep.subr.bf16.mxu0 %v1876_v32  ;;  %1201 = vmatprep.subr.bf16.mxu1 %v1878_v33 }
  0x6e   :  { %1129 = vmatpush1.bf16.msra.mxu0 %v1875_v39  ;;  %1202 = vmatpush1.bf16.msra.mxu1 %v1877_v40 }
  0x6f   :  { %1130 = vmatprep.subr.bf16.mxu0 %v1884_v41  ;;  %1203 = vmatprep.subr.bf16.mxu1 %v1886_v42 }
  0x72   :  { %1131 = vmatpush1.bf16.msra.mxu0 %v1883_v47  ;;  %1204 = vmatpush1.bf16.msra.mxu1 %v1885_v49 }
  0x73   :  { %1132 = vmatprep.subr.bf16.mxu0 %v1892_v50  ;;  %1205 = vmatprep.subr.bf16.mxu1 %v1894_v51 }
  0x76   :  { %1133 = vmatpush1.bf16.msra.mxu0 %v1891_v58  ;;  %1206 = vmatpush1.bf16.msra.mxu1 %v1893_v59 }
  0x77   :  { %1134 = vmatprep.subr.bf16.mxu0 %v1900_v60  ;;  %1207 = vmatprep.subr.bf16.mxu1 %v1902_v61 }
  0x7a   :  { %1135 = vmatpush1.bf16.msra.mxu0 %v1899_v2  ;;  %1208 = vmatpush1.bf16.msra.mxu1 %v1901_v4 }
  0x7b   :  { %1136 = vmatprep.subr.bf16.mxu0 %v1908_v5  ;;  %1209 = vmatprep.subr.bf16.mxu1 %v1910_v6 }
  0x7e   :  { %1137 = vmatpush1.bf16.msra.mxu0 %v1907_v12  ;;  %1210 = vmatpush1.bf16.msra.mxu1 %v1909_v13 }
  0x7f   :  { %1138 = vmatprep.subr.bf16.mxu0 %v1916_v14  ;;  %1211 = vmatprep.subr.bf16.mxu1 %v1918_v15 }
  0x82   :  { %1139 = vmatpush1.bf16.msra.mxu0 %v1915_v16  ;;  %1212 = vmatpush1.bf16.msra.mxu1 %v1917_v17 }
  0x85   :  { %1141 = vmatmul.mubr.bf16.vlgmr.msra.gmra.mrb[16].mxu0 %v2235_v10  ;;  %1214 = vmatmul.mubr.bf16.vlgmr.msra.gmra.mrb[16].mxu1 %v2235_v10  ;;  %v1451_v10 = vlaneseq }
  0x86   :  { %1150 = vmatprep.mubr.bf16.mxu0 %v2252_v19  ;;  %1223 = vmatprep.mubr.bf16.mxu1 %v2252_v19 }
  0x87   :  { %v1452_v19 = vshrl.u32 %v1451_v10, 7 }
  0x89   :  { %v1469_v18 = vsub.s32 4, %v1452_v19  ;;  %v1473_v20 = vsub.s32 5, %v1452_v19  ;;  %v1481_v21 = vsub.s32 7, %v1452_v19  ;;  %v1453_v24 = vsub.s32 0, %v1452_v19 }
  0x8a   :  { %v1457_v25 = vsub.s32 1, %v1452_v19  ;;  %v1465_v26 = vsub.s32 3, %v1452_v19 }
  0x8d   :  { %1151 = vmatmul.mubr.bf16.gmra.mrb[20].mxu0 %v2279_v30  ;;  %1224 = vmatmul.mubr.bf16.gmra.mrb[20].mxu1 %v2279_v30  ;;  %v1477_v30 = vsub.s32 6, %v1452_v19 }
  0x8e   :  { %1160 = vmatprep.mubr.bf16.mxu0 %v2290_v37  ;;  %1233 = vmatprep.mubr.bf16.mxu1 %v2290_v37  ;;  %v1449_v37 = vld [vmem:[%s2652_s2] sm:$0xff] }
  0x8f   :  { %v2474_v22 = vrot.slane %v1449_v37, %v1469_v18  ;;  %v2478_v23 = vrot.slane %v1449_v37, %v1473_v20  ;;  %v2482_v27 = vrot.slane %v1449_v37, %v1453_v24  ;;  %v2486_v28 = vrot.slane %v1449_v37, %v1457_v25 }
  0x90   :  { %v2488_v29 = vrot.slane %v1449_v37, %v1465_v26 }
  0x95   :  { %1161 = vmatmul.mubr.bf16.gmra.mrb[24].mxu0 %v2317_v48  ;;  %1234 = vmatmul.mubr.bf16.gmra.mrb[24].mxu1 %v2317_v48  ;;  %v2476_v48 = vrot.slane %v1449_v37, %v1477_v30 }
  0x96   :  { %1170 = vmatprep.mubr.bf16.mxu0 %v2328_v55  ;;  %1243 = vmatprep.mubr.bf16.mxu1 %v2328_v55  ;;  %v2480_v55 = vrot.slane %v1449_v37, %v1481_v21 }
  0x9d   :  { %1171 = vmatmul.mubr.bf16.gmra.mrb[28].mxu0 %v2355_v3  ;;  %1244 = vmatmul.mubr.bf16.gmra.mrb[28].mxu1 %v2355_v3  ;;  %v1461_v3 = vsub.s32 2, %v1452_v19 }
  0x9f   :  { %v2484_v56 = vrot.slane %v1449_v37, %v1461_v3 }
 0x118   :  { %v996_v31 = vpop.f32.mrb[0].mxu0  ;;  %v1069_v33 = vpop.f32.mrb[0].mxu1 }
 0x119   :  { %v1491_v32 = vadd.f32 %v2482_v27, %v996_v31  ;;  %v998_v34 = vpop.f32.mrb[1].mxu0  ;;  %v1493_v35 = vadd.f32 %v2484_v56, %v1069_v33  ;;  %v1071_v38 = vpop.f32.mrb[1].mxu1 }
 0x11a   :  { %v1492_v36 = vadd.f32 %v2486_v28, %v998_v34  ;;  %v1000_v39 = vpop.f32.mrb[2].mxu0  ;;  %v1494_v40 = vadd.f32 %v2488_v29, %v1071_v38  ;;  %v1073_v42 = vpop.f32.mrb[2].mxu1 }
 0x11b   :  { %v1499_v41 = vadd.f32 %v2482_v27, %v1000_v39  ;;  %v1002_v43 = vpop.f32.mrb[3].mxu0  ;;  %v1501_v45 = vadd.f32 %v2484_v56, %v1073_v42  ;;  %v1075_v47 = vpop.f32.mrb[3].mxu1 }
 0x11c   :  { %v1951_v44 = vpack.c.bf16 %v1492_v36, %v1491_v32  ;;  %v1500_v46 = vadd.f32 %v2486_v28, %v1002_v43  ;;  %v1952_v49 = vpack.c.bf16 %v1494_v40, %v1493_v35  ;;  %v1502_v50 = vadd.f32 %v2488_v29, %v1075_v47 }
 0x11e   :  { %1747 = vst [vmem:[%s2653_s3] sm:$0xff] %v1951_v44  ;;  %v1955_v51 = vpack.c.bf16 %v1500_v46, %v1499_v41  ;;  %1748 = vst [vmem:[%s2653_s3 + $0x8] sm:$0xff] %v1952_v49  ;;  %v1956_v52 = vpack.c.bf16 %v1502_v50, %v1501_v45 }
 0x120   :  { %1751 = vst [vmem:[%s2653_s3 + $0x20] sm:$0xff] %v1955_v51  ;;  %v1006_v53 = vpop.f32.mrb[4].mxu0  ;;  %1752 = vst [vmem:[%s2653_s3 + $0x28] sm:$0xff] %v1956_v52  ;;  %v1079_v57 = vpop.f32.mrb[4].mxu1 }
 0x121   :  { %v1507_v54 = vadd.f32 %v2482_v27, %v1006_v53  ;;  %v1008_v58 = vpop.f32.mrb[5].mxu0  ;;  %v1509_v59 = vadd.f32 %v2484_v56, %v1079_v57  ;;  %v1081_v61 = vpop.f32.mrb[5].mxu1 }
 0x122   :  { %v1508_v60 = vadd.f32 %v2486_v28, %v1008_v58  ;;  %v1010_v62 = vpop.f32.mrb[6].mxu0  ;;  %v1510_v63 = vadd.f32 %v2488_v29, %v1081_v61  ;;  %v1083_v1 = vpop.f32.mrb[6].mxu1 }
 0x123   :  { %v1515_v0 = vadd.f32 %v2482_v27, %v1010_v62  ;;  %v1012_v2 = vpop.f32.mrb[7].mxu0  ;;  %v1517_v5 = vadd.f32 %v2484_v56, %v1083_v1  ;;  %v1085_v7 = vpop.f32.mrb[7].mxu1 }
 0x124   :  { %v1959_v4 = vpack.c.bf16 %v1508_v60, %v1507_v54  ;;  %v1516_v6 = vadd.f32 %v2486_v28, %v1012_v2  ;;  %v1960_v8 = vpack.c.bf16 %v1510_v63, %v1509_v59  ;;  %v1518_v9 = vadd.f32 %v2488_v29, %v1085_v7 }
 0x126   :  { %1755 = vst [vmem:[%s2653_s3 + $0x40] sm:$0xff] %v1959_v4  ;;  %v1963_v11 = vpack.c.bf16 %v1516_v6, %v1515_v0  ;;  %1756 = vst [vmem:[%s2653_s3 + $0x48] sm:$0xff] %v1960_v8  ;;  %v1964_v12 = vpack.c.bf16 %v1518_v9, %v1517_v5 }
 0x128   :  { %1759 = vst [vmem:[%s2653_s3 + $0x60] sm:$0xff] %v1963_v11  ;;  %v1016_v13 = vpop.f32.mrb[8].mxu0  ;;  %1760 = vst [vmem:[%s2653_s3 + $0x68] sm:$0xff] %v1964_v12  ;;  %v1089_v15 = vpop.f32.mrb[8].mxu1 }
 0x129   :  { %v1523_v14 = vadd.f32 %v2482_v27, %v1016_v13  ;;  %v1018_v16 = vpop.f32.mrb[9].mxu0  ;;  %v1525_v17 = vadd.f32 %v2484_v56, %v1089_v15  ;;  %v1091_v19 = vpop.f32.mrb[9].mxu1 }
 0x12a   :  { %v1524_v10 = vadd.f32 %v2486_v28, %v1018_v16  ;;  %v1020_v18 = vpop.f32.mrb[10].mxu0  ;;  %v1526_v30 = vadd.f32 %v2488_v29, %v1091_v19  ;;  %v1093_v20 = vpop.f32.mrb[10].mxu1 }
 0x12b   :  { %v1531_v37 = vadd.f32 %v2482_v27, %v1020_v18  ;;  %v1022_v21 = vpop.f32.mrb[11].mxu0  ;;  %v1533_v3 = vadd.f32 %v2484_v56, %v1093_v20  ;;  %v1095_v26 = vpop.f32.mrb[11].mxu1 }
 0x12c   :  { %v1967_v24 = vpack.c.bf16 %v1524_v10, %v1523_v14  ;;  %v1532_v25 = vadd.f32 %v2486_v28, %v1022_v21  ;;  %v1968_v31 = vpack.c.bf16 %v1526_v30, %v1525_v17  ;;  %v1534_v32 = vadd.f32 %v2488_v29, %v1095_v26 }
 0x12e   :  { %1763 = vst [vmem:[%s2653_s3 + $0x80] sm:$0xff] %v1967_v24  ;;  %v1971_v33 = vpack.c.bf16 %v1532_v25, %v1531_v37  ;;  %1764 = vst [vmem:[%s2653_s3 + $0x88] sm:$0xff] %v1968_v31  ;;  %v1972_v34 = vpack.c.bf16 %v1534_v32, %v1533_v3 }
 0x130   :  { %1767 = vst [vmem:[%s2653_s3 + $0xa0] sm:$0xff] %v1971_v33  ;;  %v1026_v35 = vpop.f32.mrb[12].mxu0  ;;  %1768 = vst [vmem:[%s2653_s3 + $0xa8] sm:$0xff] %v1972_v34  ;;  %v1099_v38 = vpop.f32.mrb[12].mxu1 }
 0x131   :  { %v1539_v36 = vadd.f32 %v2482_v27, %v1026_v35  ;;  %v1028_v39 = vpop.f32.mrb[13].mxu0  ;;  %v1541_v40 = vadd.f32 %v2484_v56, %v1099_v38  ;;  %v1101_v42 = vpop.f32.mrb[13].mxu1 }
 0x132   :  { %v1540_v41 = vadd.f32 %v2486_v28, %v1028_v39  ;;  %v1030_v43 = vpop.f32.mrb[14].mxu0  ;;  %v1542_v44 = vadd.f32 %v2488_v29, %v1101_v42  ;;  %v1103_v46 = vpop.f32.mrb[14].mxu1 }
 0x133   :  { %v1547_v45 = vadd.f32 %v2482_v27, %v1030_v43  ;;  %v1032_v47 = vpop.f32.mrb[15].mxu0  ;;  %v1549_v50 = vadd.f32 %v2484_v56, %v1103_v46  ;;  %v1105_v52 = vpop.f32.mrb[15].mxu1 }
 0x134   :  { %v1975_v49 = vpack.c.bf16 %v1540_v41, %v1539_v36  ;;  %v1548_v51 = vadd.f32 %v2486_v28, %v1032_v47  ;;  %v1976_v53 = vpack.c.bf16 %v1542_v44, %v1541_v40  ;;  %v1550_v54 = vadd.f32 %v2488_v29, %v1105_v52 }
 0x136   :  { %1771 = vst [vmem:[%s2653_s3 + $0xc0] sm:$0xff] %v1975_v49  ;;  %v1979_v57 = vpack.c.bf16 %v1548_v51, %v1547_v45  ;;  %1772 = vst [vmem:[%s2653_s3 + $0xc8] sm:$0xff] %v1976_v53  ;;  %v1980_v27 = vpack.c.bf16 %v1550_v54, %v1549_v50 }
 0x138   :  { %1775 = vst [vmem:[%s2653_s3 + $0xe0] sm:$0xff] %v1979_v57  ;;  %1776 = vst [vmem:[%s2653_s3 + $0xe8] sm:$0xff] %v1980_v27 }
 0x158   :  { %v1142_v56 = vpop.f32.mrb[16].mxu0  ;;  %v1215_v29 = vpop.f32.mrb[16].mxu1 }
 0x159   :  { %v1495_v28 = vadd.f32 %v2474_v22, %v1142_v56  ;;  %v1144_v58 = vpop.f32.mrb[17].mxu0  ;;  %v1497_v59 = vadd.f32 %v2476_v48, %v1215_v29  ;;  %v1217_v61 = vpop.f32.mrb[17].mxu1 }
 0x15a   :  { %v1496_v60 = vadd.f32 %v2478_v23, %v1144_v58  ;;  %v1146_v62 = vpop.f32.mrb[18].mxu0  ;;  %v1498_v63 = vadd.f32 %v2480_v55, %v1217_v61  ;;  %v1219_v1 = vpop.f32.mrb[18].mxu1 }
 0x15b   :  { %v1503_v0 = vadd.f32 %v2474_v22, %v1146_v62  ;;  %v1148_v2 = vpop.f32.mrb[19].mxu0  ;;  %v1505_v5 = vadd.f32 %v2476_v48, %v1219_v1  ;;  %v1221_v7 = vpop.f32.mrb[19].mxu1 }
 0x15c   :  { %v1953_v4 = vpack.c.bf16 %v1496_v60, %v1495_v28  ;;  %v1504_v6 = vadd.f32 %v2478_v23, %v1148_v2  ;;  %v1954_v8 = vpack.c.bf16 %v1498_v63, %v1497_v59  ;;  %v1506_v9 = vadd.f32 %v2480_v55, %v1221_v7 }
 0x15e   :  { %1749 = vst [vmem:[%s2653_s3 + $0x10] sm:$0xff] %v1953_v4  ;;  %v1957_v11 = vpack.c.bf16 %v1504_v6, %v1503_v0  ;;  %1750 = vst [vmem:[%s2653_s3 + $0x18] sm:$0xff] %v1954_v8  ;;  %v1958_v12 = vpack.c.bf16 %v1506_v9, %v1505_v5 }
 0x160   :  { %1753 = vst [vmem:[%s2653_s3 + $0x30] sm:$0xff] %v1957_v11  ;;  %v1152_v13 = vpop.f32.mrb[20].mxu0  ;;  %1754 = vst [vmem:[%s2653_s3 + $0x38] sm:$0xff] %v1958_v12  ;;  %v1225_v15 = vpop.f32.mrb[20].mxu1 }
 0x161   :  { %v1511_v14 = vadd.f32 %v2474_v22, %v1152_v13  ;;  %v1154_v16 = vpop.f32.mrb[21].mxu0  ;;  %v1513_v17 = vadd.f32 %v2476_v48, %v1225_v15  ;;  %v1227_v19 = vpop.f32.mrb[21].mxu1 }
 0x162   :  { %v1512_v10 = vadd.f32 %v2478_v23, %v1154_v16  ;;  %v1156_v18 = vpop.f32.mrb[22].mxu0  ;;  %v1514_v30 = vadd.f32 %v2480_v55, %v1227_v19  ;;  %v1229_v20 = vpop.f32.mrb[22].mxu1 }
 0x163   :  { %v1519_v37 = vadd.f32 %v2474_v22, %v1156_v18  ;;  %v1158_v21 = vpop.f32.mrb[23].mxu0  ;;  %v1521_v3 = vadd.f32 %v2476_v48, %v1229_v20  ;;  %v1231_v26 = vpop.f32.mrb[23].mxu1 }
 0x164   :  { %v1961_v24 = vpack.c.bf16 %v1512_v10, %v1511_v14  ;;  %v1520_v25 = vadd.f32 %v2478_v23, %v1158_v21  ;;  %v1962_v31 = vpack.c.bf16 %v1514_v30, %v1513_v17  ;;  %v1522_v32 = vadd.f32 %v2480_v55, %v1231_v26 }
 0x166   :  { %1757 = vst [vmem:[%s2653_s3 + $0x50] sm:$0xff] %v1961_v24  ;;  %v1965_v33 = vpack.c.bf16 %v1520_v25, %v1519_v37  ;;  %1758 = vst [vmem:[%s2653_s3 + $0x58] sm:$0xff] %v1962_v31  ;;  %v1966_v34 = vpack.c.bf16 %v1522_v32, %v1521_v3 }
 0x168   :  { %1761 = vst [vmem:[%s2653_s3 + $0x70] sm:$0xff] %v1965_v33  ;;  %v1162_v35 = vpop.f32.mrb[24].mxu0  ;;  %1762 = vst [vmem:[%s2653_s3 + $0x78] sm:$0xff] %v1966_v34  ;;  %v1235_v38 = vpop.f32.mrb[24].mxu1 }
 0x169   :  { %v1527_v36 = vadd.f32 %v2474_v22, %v1162_v35  ;;  %v1164_v39 = vpop.f32.mrb[25].mxu0  ;;  %v1529_v40 = vadd.f32 %v2476_v48, %v1235_v38  ;;  %v1237_v42 = vpop.f32.mrb[25].mxu1 }
 0x16a   :  { %v1528_v41 = vadd.f32 %v2478_v23, %v1164_v39  ;;  %v1166_v43 = vpop.f32.mrb[26].mxu0  ;;  %v1530_v44 = vadd.f32 %v2480_v55, %v1237_v42  ;;  %v1239_v46 = vpop.f32.mrb[26].mxu1 }
 0x16b   :  { %v1535_v45 = vadd.f32 %v2474_v22, %v1166_v43  ;;  %v1168_v47 = vpop.f32.mrb[27].mxu0  ;;  %v1537_v50 = vadd.f32 %v2476_v48, %v1239_v46  ;;  %v1241_v52 = vpop.f32.mrb[27].mxu1 }
 0x16c   :  { %v1969_v49 = vpack.c.bf16 %v1528_v41, %v1527_v36  ;;  %v1536_v51 = vadd.f32 %v2478_v23, %v1168_v47  ;;  %v1970_v53 = vpack.c.bf16 %v1530_v44, %v1529_v40  ;;  %v1538_v54 = vadd.f32 %v2480_v55, %v1241_v52 }
 0x16e   :  { %1765 = vst [vmem:[%s2653_s3 + $0x90] sm:$0xff] %v1969_v49  ;;  %v1973_v57 = vpack.c.bf16 %v1536_v51, %v1535_v45  ;;  %1766 = vst [vmem:[%s2653_s3 + $0x98] sm:$0xff] %v1970_v53  ;;  %v1974_v27 = vpack.c.bf16 %v1538_v54, %v1537_v50 }
 0x170   :  { %1769 = vst [vmem:[%s2653_s3 + $0xb0] sm:$0xff] %v1973_v57  ;;  %v1172_v56 = vpop.f32.mrb[28].mxu0  ;;  %1770 = vst [vmem:[%s2653_s3 + $0xb8] sm:$0xff] %v1974_v27  ;;  %v1245_v29 = vpop.f32.mrb[28].mxu1 }
 0x171   :  { %v1543_v28 = vadd.f32 %v2474_v22, %v1172_v56  ;;  %v1174_v58 = vpop.f32.mrb[29].mxu0  ;;  %v1545_v59 = vadd.f32 %v2476_v48, %v1245_v29  ;;  %v1247_v61 = vpop.f32.mrb[29].mxu1 }
 0x172   :  { %v1544_v60 = vadd.f32 %v2478_v23, %v1174_v58  ;;  %v1176_v62 = vpop.f32.mrb[30].mxu0  ;;  %v1546_v63 = vadd.f32 %v2480_v55, %v1247_v61  ;;  %v1249_v1 = vpop.f32.mrb[30].mxu1 }
 0x173   :  { %v1551_v0 = vadd.f32 %v2474_v22, %v1176_v62  ;;  %v1178_v2 = vpop.f32.mrb[31].mxu0  ;;  %v1553_v5 = vadd.f32 %v2476_v48, %v1249_v1  ;;  %v1251_v7 = vpop.f32.mrb[31].mxu1 }
 0x174   :  { %v1977_v4 = vpack.c.bf16 %v1544_v60, %v1543_v28  ;;  %v1552_v6 = vadd.f32 %v2478_v23, %v1178_v2  ;;  %v1978_v8 = vpack.c.bf16 %v1546_v63, %v1545_v59  ;;  %v1554_v9 = vadd.f32 %v2480_v55, %v1251_v7 }
 0x176   :  { %1773 = vst [vmem:[%s2653_s3 + $0xd0] sm:$0xff] %v1977_v4  ;;  %v1981_v11 = vpack.c.bf16 %v1552_v6, %v1551_v0  ;;  %1774 = vst [vmem:[%s2653_s3 + $0xd8] sm:$0xff] %v1978_v8  ;;  %v1982_v22 = vpack.c.bf16 %v1554_v9, %v1553_v5 }
 0x178   :  { %1777 = vst [vmem:[%s2653_s3 + $0xf0] sm:$0xff] %v1981_v11  ;;  %1778 = vst [vmem:[%s2653_s3 + $0xf8] sm:$0xff] %v1982_v22 }

</bundles_post_ra>
